<compile_context>
chip_gen: v7x
topology: tpu7x:2x2x1
jax: 0.10.0
libtpu: 0.0.40
codegen_flags: <defaults>
</compile_context>

<pallas_src>
import functools
import math

import jax
import jax.numpy as jnp
from jax.experimental import pallas as pl
from jax.experimental.pallas import tpu as pltpu


def _layer_norm(z, gamma, beta, eps=1e-5):
    mu = jnp.mean(z, axis=-1, keepdims=True)
    var = jnp.mean((z - mu) ** 2, axis=-1, keepdims=True)
    return (z - mu) * jax.lax.rsqrt(var + eps) * gamma + beta


# Row indices inside the packed (7, D) f32 vector bundle (biases + LayerNorm params).
_BQ, _BO, _B2, _G1, _BETA1, _G2, _BETA2 = range(7)
_NVEC = 7


def encoder_layer_kernel(xq_ref, kh_ref, vh_ref, mask_ref,
                         wq_ref, wo_ref, w1_ref, w2_ref,
                         vecd_ref, b1_ref,
                         out_ref,
                         q_sc, m_sc, l_sc, acc_sc, *, num_heads):
    ki = pl.program_id(2)
    nk = pl.num_programs(2)
    bf16 = jnp.bfloat16

    _, TQ, D = xq_ref.shape
    depth = D // num_heads
    scale = 1.0 / math.sqrt(depth)

    def row(i):                          # packed (1, D) f32 bias / LN vectors
        return vecd_ref[i:i + 1, :]

    # --- per-(batch, query-tile) init: online-softmax state + Q projection (once) ---
    @pl.when(ki == 0)
    def _():
        m_sc[...] = jnp.full_like(m_sc, -jnp.inf)
        l_sc[...] = jnp.zeros_like(l_sc)
        acc_sc[...] = jnp.zeros_like(acc_sc)
        q = jnp.dot(xq_ref[0].astype(bf16), wq_ref[...],
                    preferred_element_type=jnp.float32) + row(_BQ)
        q = q * scale                    # fold 1/sqrt(depth) into q once
        q_sc[...] = jnp.transpose(q.reshape(TQ, num_heads, depth), (1, 0, 2)).astype(bf16)

    # --- online-softmax attention over this key tile (bounded (H, TQ, TK) state) ---
    kh = kh_ref[0]                       # (H, TK, depth) bf16, precomputed in wrapper
    vh = vh_ref[0]                       # (H, TK, depth) bf16
    neg_mask = mask_ref[0] * (-1e9)      # (1, TK) f32, hoisted once per tile

    s = jnp.einsum("hqd,hkd->hqk", q_sc[...], kh,
                   preferred_element_type=jnp.float32)        # (H, TQ, TK) f32
    s = s + neg_mask                                           # broadcast over (H, TQ)

    m_prev = m_sc[...]
    m_new = jnp.maximum(m_prev, jnp.max(s, axis=-1, keepdims=True))
    alpha = jnp.exp(m_prev - m_new)
    # exp kept in f32 (v5e EUP has no bf16 path); p is cast to bf16 for the AV matmul.
    p = jnp.exp(s - m_new)
    l_sc[...] = alpha * l_sc[...] + jnp.sum(p, axis=-1, keepdims=True)
    acc_sc[...] = alpha * acc_sc[...] + jnp.einsum(
        "hqk,hkd->hqd", p.astype(bf16), vh, preferred_element_type=jnp.float32)
    m_sc[...] = m_new

    # --- epilogue on the last key tile: out-proj, LN1, FFN, LN2 ---
    @pl.when(ki == nk - 1)
    def _():
        inv_l = pl.reciprocal(l_sc[...], approx=True)          # EUP slot
        attn = (acc_sc[...] * inv_l).astype(bf16)              # (H, TQ, depth)
        # fused head-merge + output projection: batched per-head matmul against
        # wo reshaped (H, depth, D), then a cheap sum over heads — no XLU transpose.
        proj = jnp.einsum("hqd,hde->hqe", attn, wo_ref[...],
                          preferred_element_type=jnp.float32)  # (H, TQ, D)
        attn_out = jnp.sum(proj, axis=0) + row(_BO)            # (TQ, D)
        # TODO(synk): F.dropout is stochastic; treated as identity (inference mode).

        x1 = _layer_norm(xq_ref[0] + attn_out, row(_G1), row(_BETA1))

        # point-wise feed-forward network
        h1 = jnp.dot(x1.astype(bf16), w1_ref[...],
                     preferred_element_type=jnp.float32) + b1_ref[...]
        h1 = jnp.maximum(h1, 0.0)
        ffn = jnp.dot(h1.astype(bf16), w2_ref[...],
                      preferred_element_type=jnp.float32) + row(_B2)
        # TODO(synk): second dropout also identity (inference mode).

        out = _layer_norm(x1 + ffn, row(_G2), row(_BETA2))
        out_ref[0] = out.astype(out_ref.dtype)


def encoder_layer(x, mask, params, *, num_heads, q_tile=256, k_tile=512):
    B, S, D = x.shape
    dff = params["w1"].shape[1]
    assert D % num_heads == 0
    H = num_heads
    depth = D // H
    bf16 = jnp.bfloat16

    # --- pad S to a tile multiple (masking the padded keys) instead of the old
    #     TQ = S fallback, so attention intermediates are always bounded. ---
    if S <= q_tile:
        S_pad, TQ = S, S
    else:
        S_pad = pl.cdiv(S, q_tile) * q_tile
        TQ = q_tile
    if S_pad != S:
        x_p = jnp.pad(x, ((0, 0), (0, S_pad - S), (0, 0)))
        mask_p = jnp.pad(mask, ((0, 0), (0, 0), (0, S_pad - S)), constant_values=1.0)
    else:
        x_p, mask_p = x, mask
    n_q = S_pad // TQ

    # key tile: full (padded) sequence if small, else a sublane-aligned chunk
    if S_pad <= k_tile:
        TK = S_pad
    else:
        TK = k_tile if S_pad % k_tile == 0 else q_tile   # S_pad is a multiple of q_tile here
    n_k = S_pad // TK

    # --- K/V projected ONCE per sequence (not per query tile), head-major bf16 ---
    def project_heads(w, b):
        y = jnp.einsum("bsd,de->bse", x_p.astype(bf16), w.astype(bf16),
                       preferred_element_type=jnp.float32) + b
        return y.reshape(B, S_pad, H, depth).transpose(0, 2, 1, 3).astype(bf16)

    kh = project_heads(params["wk"], params["bk"])       # (B, H, S_pad, depth) bf16
    vh = project_heads(params["wv"], params["bv"])       # (B, H, S_pad, depth) bf16

    wq = params["wq"].astype(bf16)                       # (D, D)
    wo_hd = params["wo"].astype(bf16).reshape(H, depth, D)   # head-major output proj
    w1 = params["w1"].astype(bf16)                       # (D, dff)
    w2 = params["w2"].astype(bf16)                       # (dff, D)

    # Pack the seven D-wide f32 vectors (biases + LayerNorm params) into one block.
    vecd = jnp.concatenate(
        [params["bq"], params["bo"], params["b2"],
         params["g1"], params["beta1"], params["g2"], params["beta2"]], axis=0)  # (7, D)
    b1 = params["b1"]                                    # (1, dff) f32

    # --- explicit VMEM budget: single-buffered weights + double-buffered activation
    #     blocks + persistent scratch + transient attention/FFN intermediates ---
    est = (
        2 * (D * D + H * depth * D + D * dff + dff * D)            # bf16 weights (x1)
        + 4 * (_NVEC * D + dff)                                    # f32 vectors
        + 2 * (TQ * D * 4 + 2 * H * TK * depth * 2 + TK * 4 + TQ * D * 4)  # blocks (x2)
        + H * TQ * depth * 2 + 2 * H * TQ * 4 + H * TQ * depth * 4  # scratch
        + 2 * H * TQ * TK * 4 + TQ * dff * 4                       # scores/p + h1
    )
    vmem_limit = int(min(max(2 * est, 16 * 2 ** 20), 60 * 2 ** 20))

    # Grid-invariant operands: DMA'd once -> single-buffer them (no dead VMEM).
    def rep(shape):
        return pl.BlockSpec(shape, lambda *_: (0,) * len(shape),
                            pipeline_mode=pl.Buffered(1))

    in_specs = [
        pl.BlockSpec((1, TQ, D), lambda b, qi, ki: (b, qi, 0)),           # x query tile (f32)
        pl.BlockSpec((1, H, TK, depth), lambda b, qi, ki: (b, 0, ki, 0)),  # K heads (bf16)
        pl.BlockSpec((1, H, TK, depth), lambda b, qi, ki: (b, 0, ki, 0)),  # V heads (bf16)
        pl.BlockSpec((1, 1, TK), lambda b, qi, ki: (b, 0, ki)),           # mask key tile
        rep((D, D)),                                                      # wq
        rep((H, depth, D)),                                               # wo (head-major)
        rep((D, dff)), rep((dff, D)),                                     # w1, w2
        rep((_NVEC, D)),                                                  # packed f32 vectors
        rep((1, dff)),                                                    # b1
    ]

    kernel = functools.partial(encoder_layer_kernel, num_heads=num_heads)
    out_p = pl.pallas_call(
        kernel,
        out_shape=jax.ShapeDtypeStruct((B, S_pad, D), x.dtype),
        grid=(B, n_q, n_k),
        in_specs=in_specs,
        out_specs=pl.BlockSpec((1, TQ, D), lambda b, qi, ki: (b, qi, 0)),
        scratch_shapes=[
            pltpu.VMEM((H, TQ, depth), jnp.bfloat16),   # Q heads (projected once per tile)
            pltpu.VMEM((H, TQ, 1), jnp.float32),        # running max
            pltpu.VMEM((H, TQ, 1), jnp.float32),        # running denominator
            pltpu.VMEM((H, TQ, depth), jnp.float32),    # output accumulator
        ],
        compiler_params=pltpu.CompilerParams(
            dimension_semantics=("parallel", "parallel", "arbitrary"),
            vmem_limit_bytes=vmem_limit),
    )(x_p, kh, vh, mask_p, wq, wo_hd, w1, w2, vecd, b1)

    return out_p[:, :S, :] if S_pad != S else out_p


def encoder_layer_reference(x, mask, params, *, num_heads):
    """Pure-JAX reference mirroring the kernel numerics (bf16 MXU operands, f32 accum)."""
    B, S, D = x.shape
    depth = D // num_heads
    bf16, f32 = jnp.bfloat16, jnp.float32

    def mm(a, b):
        return jnp.dot(a.astype(bf16), b.astype(bf16), preferred_element_type=f32)

    q = mm(x, params["wq"]) + params["bq"]
    k = mm(x, params["wk"]) + params["bk"]
    v = mm(x, params["wv"]) + params["bv"]
    q = q * (1.0 / math.sqrt(depth))

    def split(t):  # (B, S, D) -> (B, H, S, depth)
        return t.reshape(B, S, num_heads, depth).transpose(0, 2, 1, 3)

    qh, kh, vh = split(q).astype(bf16), split(k).astype(bf16), split(v).astype(bf16)
    scores = jnp.einsum("bhqd,bhkd->bhqk", qh, kh, preferred_element_type=f32)
    scores = scores + mask[:, None, :, :] * (-1e9)
    p = jax.nn.softmax(scores, axis=-1)
    attn = jnp.einsum("bhqk,bhkd->bhqd", p.astype(bf16), vh,
                      preferred_element_type=f32)
    attn = attn.transpose(0, 2, 1, 3).reshape(B, S, D)
    attn_out = mm(attn, params["wo"]) + params["bo"]

    def ln(z, g, b):
        mu = jnp.mean(z, axis=-1, keepdims=True)
        var = jnp.mean((z - mu) ** 2, axis=-1, keepdims=True)
        return (z - mu) * jax.lax.rsqrt(var + 1e-5) * g + b

    x1 = ln(x + attn_out, params["g1"], params["beta1"])
    h1 = jnp.maximum(mm(x1, params["w1"]) + params["b1"], 0.0)
    ffn = mm(h1, params["w2"]) + params["b2"]
    return ln(x1 + ffn, params["g2"], params["beta2"])


def init_params(key, d_model, dff):
    ks = jax.random.split(key, 8)
    s = 0.05
    return {
        "wq": jax.random.normal(ks[0], (d_model, d_model), jnp.float32) * s,
        "bq": jnp.zeros((1, d_model), jnp.float32),
        "wk": jax.random.normal(ks[1], (d_model, d_model), jnp.float32) * s,
        "bk": jnp.zeros((1, d_model), jnp.float32),
        "wv": jax.random.normal(ks[2], (d_model, d_model), jnp.float32) * s,
        "bv": jnp.zeros((1, d_model), jnp.float32),
        "wo": jax.random.normal(ks[3], (d_model, d_model), jnp.float32) * s,
        "bo": jax.random.normal(ks[4], (1, d_model), jnp.float32) * s,
        "w1": jax.random.normal(ks[5], (d_model, dff), jnp.float32) * s,
        "b1": jnp.zeros((1, dff), jnp.float32),
        "w2": jax.random.normal(ks[6], (dff, d_model), jnp.float32) * s,
        "b2": jnp.zeros((1, d_model), jnp.float32),
        "g1": jnp.ones((1, d_model), jnp.float32),
        "beta1": jnp.zeros((1, d_model), jnp.float32),
        "g2": jnp.ones((1, d_model), jnp.float32),
        "beta2": jnp.zeros((1, d_model), jnp.float32),
    }


if __name__ == "__main__":
    B, S, D, H, DFF = 2, 8, 32, 4, 64

    key = jax.random.PRNGKey(0)
    kx, kp = jax.random.split(key)
    x = jax.random.normal(kx, (B, S, D), jnp.float32)
    # padding mask: batch 0 fully visible, batch 1 masks the last 2 key positions
    mask = jnp.zeros((B, 1, S), jnp.float32)
    mask = mask.at[1, 0, S - 2:].set(1.0)

    params = init_params(kp, D, DFF)

    out = encoder_layer(x, mask, params, num_heads=H)
    out = jax.block_until_ready(out)

    ref = encoder_layer_reference(x, mask, params, num_heads=H)
    assert out.shape == (B, S, D)
    max_diff = jnp.max(jnp.abs(out - ref))
    assert jnp.allclose(out, ref, atol=1e-2, rtol=1e-2), f"max abs diff {max_diff}"

    print("KERNEL_OK")
</pallas_src>

<mosaic_0001>
module attributes {stable_mosaic.version = 11 : i64} {
  func.func @encoder_layer_kernel(%arg0: i32, %arg1: i32, %arg2: i32, %arg3: memref<1x8x32xf32, #tpu.memory_space<vmem>>, %arg4: memref<1x4x8x8xbf16, #tpu.memory_space<vmem>>, %arg5: memref<1x4x8x8xbf16, #tpu.memory_space<vmem>>, %arg6: memref<1x1x8xf32, #tpu.memory_space<vmem>>, %arg7: memref<32x32xbf16, #tpu.memory_space<vmem>>, %arg8: memref<4x8x32xbf16, #tpu.memory_space<vmem>>, %arg9: memref<32x64xbf16, #tpu.memory_space<vmem>>, %arg10: memref<64x32xbf16, #tpu.memory_space<vmem>>, %arg11: memref<7x32xf32, #tpu.memory_space<vmem>>, %arg12: memref<1x64xf32, #tpu.memory_space<vmem>>, %arg13: memref<1x8x32xf32, #tpu.memory_space<vmem>>, %arg14: memref<4x8x8xbf16, #tpu.memory_space<vmem>>, %arg15: memref<4x8x1xf32, #tpu.memory_space<vmem>>, %arg16: memref<4x8x1xf32, #tpu.memory_space<vmem>>, %arg17: memref<4x8x8xf32, #tpu.memory_space<vmem>>) attributes {dimension_semantics = [#tpu.dimension_semantics<parallel>, #tpu.dimension_semantics<parallel>, #tpu.dimension_semantics<arbitrary>], iteration_bounds = array<i64: 2, 1, 1>, scalar_prefetch = 0 : i64, scratch_operands = 4 : i64, tpu.core_type = #tpu.core_type<tc>, window_params = [{transform_indices = @transform_0, window_bounds = array<i64: 1, 8, 32>}, {transform_indices = @transform_1, window_bounds = array<i64: 1, 4, 8, 8>}, {transform_indices = @transform_2, window_bounds = array<i64: 1, 4, 8, 8>}, {transform_indices = @transform_3, window_bounds = array<i64: 1, 1, 8>}, {pipeline_mode = #tpu.pipeline_mode<synchronous>, transform_indices = @transform_4, window_bounds = array<i64: 32, 32>}, {pipeline_mode = #tpu.pipeline_mode<synchronous>, transform_indices = @transform_5, window_bounds = array<i64: 4, 8, 32>}, {pipeline_mode = #tpu.pipeline_mode<synchronous>, transform_indices = @transform_6, window_bounds = array<i64: 32, 64>}, {pipeline_mode = #tpu.pipeline_mode<synchronous>, transform_indices = @transform_7, window_bounds = array<i64: 64, 32>}, {pipeline_mode = #tpu.pipeline_mode<synchronous>, transform_indices = @transform_8, window_bounds = array<i64: 7, 32>}, {pipeline_mode = #tpu.pipeline_mode<synchronous>, transform_indices = @transform_9, window_bounds = array<i64: 1, 64>}, {transform_indices = @transform_10, window_bounds = array<i64: 1, 8, 32>}]} {
    %c0_i32 = arith.constant 0 : i32
    %0 = arith.cmpi eq, %arg2, %c0_i32 : i32
    %1 = arith.extui %0 : i1 to i32
    %c0_i32_0 = arith.constant 0 : i32
    %2 = arith.cmpi ne, %1, %c0_i32_0 : i32
    scf.if %2 {
      %cst_38 = arith.constant 0xFF800000 : f32
      %42 = vector.broadcast %cst_38 : f32 to vector<4x8x1xf32>
      %c0_39 = arith.constant 0 : index
      %c0_40 = arith.constant 0 : index
      %c0_41 = arith.constant 0 : index
      %43 = vector.load %arg15[%c0_39, %c0_40, %c0_41] : memref<4x8x1xf32, #tpu.memory_space<vmem>>, vector<4x8x1xf32>
      tpu.vector_store %arg15[%c0_39, %c0_40, %c0_41], %42 {strides = array<i32>} : memref<4x8x1xf32, #tpu.memory_space<vmem>>, vector<4x8x1xf32>,
      %cst_42 = arith.constant 0.000000e+00 : f32
      %44 = vector.broadcast %cst_42 : f32 to vector<4x8x1xf32>
      %c0_43 = arith.constant 0 : index
      %c0_44 = arith.constant 0 : index
      %c0_45 = arith.constant 0 : index
      %45 = vector.load %arg16[%c0_43, %c0_44, %c0_45] : memref<4x8x1xf32, #tpu.memory_space<vmem>>, vector<4x8x1xf32>
      tpu.vector_store %arg16[%c0_43, %c0_44, %c0_45], %44 {strides = array<i32>} : memref<4x8x1xf32, #tpu.memory_space<vmem>>, vector<4x8x1xf32>,
      %cst_46 = arith.constant 0.000000e+00 : f32
      %46 = vector.broadcast %cst_46 : f32 to vector<4x8x8xf32>
      %c0_47 = arith.constant 0 : index
      %c0_48 = arith.constant 0 : index
      %c0_49 = arith.constant 0 : index
      %47 = vector.load %arg17[%c0_47, %c0_48, %c0_49] : memref<4x8x8xf32, #tpu.memory_space<vmem>>, vector<4x8x8xf32>
      tpu.vector_store %arg17[%c0_47, %c0_48, %c0_49], %46 {strides = array<i32>} : memref<4x8x8xf32, #tpu.memory_space<vmem>>, vector<4x8x8xf32>,
      %c0_50 = arith.constant 0 : index
      %c0_51 = arith.constant 0 : index
      %c0_52 = arith.constant 0 : index
      %48 = vector.load %arg3[%c0_50, %c0_51, %c0_52] : memref<1x8x32xf32, #tpu.memory_space<vmem>>, vector<1x8x32xf32>
      %49 = vector.shape_cast %48 : vector<1x8x32xf32> to vector<8x32xf32>
      %50 = arith.truncf %49 : vector<8x32xf32> to vector<8x32xbf16>
      %c0_53 = arith.constant 0 : index
      %c0_54 = arith.constant 0 : index
      %51 = vector.load %arg7[%c0_53, %c0_54] : memref<32x32xbf16, #tpu.memory_space<vmem>>, vector<32x32xbf16>
      %cst_55 = arith.constant dense<0.000000e+00> : vector<8x32xf32>
      %52 = tpu.matmul %50, %51, %cst_55 {dimension_numbers = #tpu.dot_dimension_numbers<[1], [0], [0], [1], [0, 0, 1, 1], [], []>} : vector<8x32xbf16>, vector<32x32xbf16>, vector<8x32xf32> -> vector<8x32xf32>
      %c0_56 = arith.constant 0 : index
      %c0_57 = arith.constant 0 : index
      %53 = vector.load %arg11[%c0_56, %c0_57] : memref<7x32xf32, #tpu.memory_space<vmem>>, vector<1x32xf32>
      %54 = vector.broadcast %53 : vector<1x32xf32> to vector<8x32xf32>
      %55 = arith.addf %52, %54 : vector<8x32xf32>
      %cst_58 = arith.constant 0.353553385 : f32
      %56 = vector.broadcast %cst_58 : f32 to vector<8x32xf32>
      %57 = arith.mulf %55, %56 : vector<8x32xf32>
      %58 = vector.shape_cast %57 : vector<8x32xf32> to vector<8x4x8xf32>
      %59 = tpu.transpose %58, [1, 0, 2] : vector<8x4x8xf32> -> vector<4x8x8xf32>
      %60 = arith.truncf %59 : vector<4x8x8xf32> to vector<4x8x8xbf16>
      %c0_59 = arith.constant 0 : index
      %c0_60 = arith.constant 0 : index
      %c0_61 = arith.constant 0 : index
      %61 = vector.load %arg14[%c0_59, %c0_60, %c0_61] : memref<4x8x8xbf16, #tpu.memory_space<vmem>>, vector<4x8x8xbf16>
      tpu.vector_store %arg14[%c0_59, %c0_60, %c0_61], %60 {strides = array<i32>} : memref<4x8x8xbf16, #tpu.memory_space<vmem>>, vector<4x8x8xbf16>,
    } else {
    }
    %c0 = arith.constant 0 : index
    %c0_1 = arith.constant 0 : index
    %c0_2 = arith.constant 0 : index
    %c0_3 = arith.constant 0 : index
    %3 = vector.load %arg4[%c0, %c0_1, %c0_2, %c0_3] : memref<1x4x8x8xbf16, #tpu.memory_space<vmem>>, vector<1x4x8x8xbf16>
    %4 = vector.shape_cast %3 : vector<1x4x8x8xbf16> to vector<4x8x8xbf16>
    %c0_4 = arith.constant 0 : index
    %c0_5 = arith.constant 0 : index
    %c0_6 = arith.constant 0 : index
    %c0_7 = arith.constant 0 : index
    %5 = vector.load %arg5[%c0_4, %c0_5, %c0_6, %c0_7] : memref<1x4x8x8xbf16, #tpu.memory_space<vmem>>, vector<1x4x8x8xbf16>
    %6 = vector.shape_cast %5 : vector<1x4x8x8xbf16> to vector<4x8x8xbf16>
    %c0_8 = arith.constant 0 : index
    %c0_9 = arith.constant 0 : index
    %c0_10 = arith.constant 0 : index
    %7 = vector.load %arg6[%c0_8, %c0_9, %c0_10] : memref<1x1x8xf32, #tpu.memory_space<vmem>>, vector<1x1x8xf32>
    %8 = vector.shape_cast %7 : vector<1x1x8xf32> to vector<1x8xf32>
    %cst = arith.constant -1.000000e+09 : f32
    %9 = vector.broadcast %cst : f32 to vector<1x8xf32>
    %10 = arith.mulf %8, %9 : vector<1x8xf32>
    %c0_11 = arith.constant 0 : index
    %c0_12 = arith.constant 0 : index
    %c0_13 = arith.constant 0 : index
    %11 = vector.load %arg14[%c0_11, %c0_12, %c0_13] : memref<4x8x8xbf16, #tpu.memory_space<vmem>>, vector<4x8x8xbf16>
    "tpu.trace_start"() <{level = 10 : i32, message = "hqd,hkd->hqk"}> : () -> ()
    %cst_14 = arith.constant dense<0.000000e+00> : vector<4x8x8xf32>
    %12 = tpu.matmul %11, %4, %cst_14 {dimension_numbers = #tpu.dot_dimension_numbers<[2], [2], [1], [1], [0, 0, 0, 1, 1, 1], [0], [0]>} : vector<4x8x8xbf16>, vector<4x8x8xbf16>, vector<4x8x8xf32> -> vector<4x8x8xf32>
    "tpu.trace_stop"() : () -> ()
    %13 = vector.shape_cast %10 : vector<1x8xf32> to vector<1x1x8xf32>
    %14 = vector.broadcast %13 : vector<1x1x8xf32> to vector<4x8x8xf32>
    %15 = arith.addf %12, %14 : vector<4x8x8xf32>
    %c0_15 = arith.constant 0 : index
    %c0_16 = arith.constant 0 : index
    %c0_17 = arith.constant 0 : index
    %16 = vector.load %arg15[%c0_15, %c0_16, %c0_17] : memref<4x8x1xf32, #tpu.memory_space<vmem>>, vector<4x8x1xf32>
    %cst_18 = arith.constant dense<0xFF800000> : vector<4x8xf32>
    %17 = vector.multi_reduction <maximumf>, %15, %cst_18 [2] : vector<4x8x8xf32> to vector<4x8xf32>
    %18 = vector.shape_cast %17 : vector<4x8xf32> to vector<4x8x1xf32>
    %19 = arith.maximumf %16, %18 : vector<4x8x1xf32>
    %20 = arith.subf %16, %19 : vector<4x8x1xf32>
    %21 = math.exp %20 : vector<4x8x1xf32>
    %22 = vector.broadcast %19 : vector<4x8x1xf32> to vector<4x8x8xf32>
    %23 = arith.subf %15, %22 : vector<4x8x8xf32>
    %24 = math.exp %23 : vector<4x8x8xf32>
    %c0_19 = arith.constant 0 : index
    %c0_20 = arith.constant 0 : index
    %c0_21 = arith.constant 0 : index
    %25 = vector.load %arg16[%c0_19, %c0_20, %c0_21] : memref<4x8x1xf32, #tpu.memory_space<vmem>>, vector<4x8x1xf32>
    %26 = arith.mulf %21, %25 : vector<4x8x1xf32>
    %cst_22 = arith.constant dense<0.000000e+00> : vector<4x8xf32>
    %27 = vector.multi_reduction <add>, %24, %cst_22 [2] : vector<4x8x8xf32> to vector<4x8xf32>
    %28 = vector.shape_cast %27 : vector<4x8xf32> to vector<4x8x1xf32>
    %29 = arith.addf %26, %28 : vector<4x8x1xf32>
    %c0_23 = arith.constant 0 : index
    %c0_24 = arith.constant 0 : index
    %c0_25 = arith.constant 0 : index
    %30 = vector.load %arg16[%c0_23, %c0_24, %c0_25] : memref<4x8x1xf32, #tpu.memory_space<vmem>>, vector<4x8x1xf32>
    tpu.vector_store %arg16[%c0_23, %c0_24, %c0_25], %29 {strides = array<i32>} : memref<4x8x1xf32, #tpu.memory_space<vmem>>, vector<4x8x1xf32>,
    %c0_26 = arith.constant 0 : index
    %c0_27 = arith.constant 0 : index
    %c0_28 = arith.constant 0 : index
    %31 = vector.load %arg17[%c0_26, %c0_27, %c0_28] : memref<4x8x8xf32, #tpu.memory_space<vmem>>, vector<4x8x8xf32>
    %32 = vector.broadcast %21 : vector<4x8x1xf32> to vector<4x8x8xf32>
    %33 = arith.mulf %32, %31 : vector<4x8x8xf32>
    %34 = arith.truncf %24 : vector<4x8x8xf32> to vector<4x8x8xbf16>
    "tpu.trace_start"() <{level = 10 : i32, message = "hqk,hkd->hqd"}> : () -> ()
    %cst_29 = arith.constant dense<0.000000e+00> : vector<4x8x8xf32>
    %35 = tpu.matmul %34, %6, %cst_29 {dimension_numbers = #tpu.dot_dimension_numbers<[2], [1], [1], [2], [0, 0, 0, 1, 1, 2], [0], [0]>} : vector<4x8x8xbf16>, vector<4x8x8xbf16>, vector<4x8x8xf32> -> vector<4x8x8xf32>
    "tpu.trace_stop"() : () -> ()
    %36 = arith.addf %33, %35 : vector<4x8x8xf32>
    %c0_30 = arith.constant 0 : index
    %c0_31 = arith.constant 0 : index
    %c0_32 = arith.constant 0 : index
    %37 = vector.load %arg17[%c0_30, %c0_31, %c0_32] : memref<4x8x8xf32, #tpu.memory_space<vmem>>, vector<4x8x8xf32>
    tpu.vector_store %arg17[%c0_30, %c0_31, %c0_32], %36 {strides = array<i32>} : memref<4x8x8xf32, #tpu.memory_space<vmem>>, vector<4x8x8xf32>,
    %c0_33 = arith.constant 0 : index
    %c0_34 = arith.constant 0 : index
    %c0_35 = arith.constant 0 : index
    %38 = vector.load %arg15[%c0_33, %c0_34, %c0_35] : memref<4x8x1xf32, #tpu.memory_space<vmem>>, vector<4x8x1xf32>
    tpu.vector_store %arg15[%c0_33, %c0_34, %c0_35], %19 {strides = array<i32>} : memref<4x8x1xf32, #tpu.memory_space<vmem>>, vector<4x8x1xf32>,
    %c0_i32_36 = arith.constant 0 : i32
    %39 = arith.cmpi eq, %arg2, %c0_i32_36 : i32
    %40 = arith.extui %39 : i1 to i32
    %c0_i32_37 = arith.constant 0 : i32
    %41 = arith.cmpi ne, %40, %c0_i32_37 : i32
    scf.if %41 {
      %c0_38 = arith.constant 0 : index
      %c0_39 = arith.constant 0 : index
      %c0_40 = arith.constant 0 : index
      %42 = vector.load %arg16[%c0_38, %c0_39, %c0_40] : memref<4x8x1xf32, #tpu.memory_space<vmem>>, vector<4x8x1xf32>
      %43 = tpu.reciprocal %42 {approx = true} : vector<4x8x1xf32> -> vector<4x8x1xf32>
      %c0_41 = arith.constant 0 : index
      %c0_42 = arith.constant 0 : index
      %c0_43 = arith.constant 0 : index
      %44 = vector.load %arg17[%c0_41, %c0_42, %c0_43] : memref<4x8x8xf32, #tpu.memory_space<vmem>>, vector<4x8x8xf32>
      %45 = vector.broadcast %43 : vector<4x8x1xf32> to vector<4x8x8xf32>
      %46 = arith.mulf %44, %45 : vector<4x8x8xf32>
      %47 = arith.truncf %46 : vector<4x8x8xf32> to vector<4x8x8xbf16>
      %c0_44 = arith.constant 0 : index
      %c0_45 = arith.constant 0 : index
      %c0_46 = arith.constant 0 : index
      %48 = vector.load %arg8[%c0_44, %c0_45, %c0_46] : memref<4x8x32xbf16, #tpu.memory_space<vmem>>, vector<4x8x32xbf16>
      "tpu.trace_start"() <{level = 10 : i32, message = "hqd,hde->hqe"}> : () -> ()
      %cst_47 = arith.constant dense<0.000000e+00> : vector<4x8x32xf32>
      %49 = tpu.matmul %47, %48, %cst_47 {dimension_numbers = #tpu.dot_dimension_numbers<[2], [1], [1], [2], [0, 0, 0, 1, 1, 2], [0], [0]>} : vector<4x8x8xbf16>, vector<4x8x32xbf16>, vector<4x8x32xf32> -> vector<4x8x32xf32>
      "tpu.trace_stop"() : () -> ()
      %cst_48 = arith.constant dense<0.000000e+00> : vector<8x32xf32>
      %50 = vector.multi_reduction <add>, %49, %cst_48 [0] : vector<4x8x32xf32> to vector<8x32xf32>
      %c1 = arith.constant 1 : index
      %c0_49 = arith.constant 0 : index
      %51 = vector.load %arg11[%c1, %c0_49] : memref<7x32xf32, #tpu.memory_space<vmem>>, vector<1x32xf32>
      %52 = vector.broadcast %51 : vector<1x32xf32> to vector<8x32xf32>
      %53 = arith.addf %50, %52 : vector<8x32xf32>
      %c0_50 = arith.constant 0 : index
      %c0_51 = arith.constant 0 : index
      %c0_52 = arith.constant 0 : index
      %54 = vector.load %arg3[%c0_50, %c0_51, %c0_52] : memref<1x8x32xf32, #tpu.memory_space<vmem>>, vector<1x8x32xf32>
      %55 = vector.shape_cast %54 : vector<1x8x32xf32> to vector<8x32xf32>
      %56 = arith.addf %55, %53 : vector<8x32xf32>
      %c3 = arith.constant 3 : index
      %c0_53 = arith.constant 0 : index
      %57 = vector.load %arg11[%c3, %c0_53] : memref<7x32xf32, #tpu.memory_space<vmem>>, vector<1x32xf32>
      %c4 = arith.constant 4 : index
      %c0_54 = arith.constant 0 : index
      %58 = vector.load %arg11[%c4, %c0_54] : memref<7x32xf32, #tpu.memory_space<vmem>>, vector<1x32xf32>
      %cst_55 = arith.constant dense<0.000000e+00> : vector<8xf32>
      %59 = vector.multi_reduction <add>, %56, %cst_55 [1] : vector<8x32xf32> to vector<8xf32>
      %60 = vector.shape_cast %59 : vector<8xf32> to vector<8x1xf32>
      %cst_56 = arith.constant 3.200000e+01 : f32
      %61 = vector.broadcast %cst_56 : f32 to vector<8x1xf32>
      %62 = arith.divf %60, %61 : vector<8x1xf32>
      %63 = vector.broadcast %62 : vector<8x1xf32> to vector<8x32xf32>
      %64 = arith.subf %56, %63 : vector<8x32xf32>
      %65 = arith.mulf %64, %64 : vector<8x32xf32>
      %cst_57 = arith.constant dense<0.000000e+00> : vector<8xf32>
      %66 = vector.multi_reduction <add>, %65, %cst_57 [1] : vector<8x32xf32> to vector<8xf32>
      %67 = vector.shape_cast %66 : vector<8xf32> to vector<8x1xf32>
      %cst_58 = arith.constant 3.200000e+01 : f32
      %68 = vector.broadcast %cst_58 : f32 to vector<8x1xf32>
      %69 = arith.divf %67, %68 : vector<8x1xf32>
      %70 = vector.broadcast %62 : vector<8x1xf32> to vector<8x32xf32>
      %71 = arith.subf %56, %70 : vector<8x32xf32>
      %cst_59 = arith.constant 9.99999974E-6 : f32
      %72 = vector.broadcast %cst_59 : f32 to vector<8x1xf32>
      %73 = arith.addf %69, %72 : vector<8x1xf32>
      %74 = math.rsqrt %73 : vector<8x1xf32>
      %75 = vector.broadcast %74 : vector<8x1xf32> to vector<8x32xf32>
      %76 = arith.mulf %71, %75 : vector<8x32xf32>
      %77 = vector.broadcast %57 : vector<1x32xf32> to vector<8x32xf32>
      %78 = arith.mulf %76, %77 : vector<8x32xf32>
      %79 = vector.broadcast %58 : vector<1x32xf32> to vector<8x32xf32>
      %80 = arith.addf %78, %79 : vector<8x32xf32>
      %81 = arith.truncf %80 : vector<8x32xf32> to vector<8x32xbf16>
      %c0_60 = arith.constant 0 : index
      %c0_61 = arith.constant 0 : index
      %82 = vector.load %arg9[%c0_60, %c0_61] : memref<32x64xbf16, #tpu.memory_space<vmem>>, vector<32x64xbf16>
      %cst_62 = arith.constant dense<0.000000e+00> : vector<8x64xf32>
      %83 = tpu.matmul %81, %82, %cst_62 {dimension_numbers = #tpu.dot_dimension_numbers<[1], [0], [0], [1], [0, 0, 1, 1], [], []>} : vector<8x32xbf16>, vector<32x64xbf16>, vector<8x64xf32> -> vector<8x64xf32>
      %c0_63 = arith.constant 0 : index
      %c0_64 = arith.constant 0 : index
      %84 = vector.load %arg12[%c0_63, %c0_64] : memref<1x64xf32, #tpu.memory_space<vmem>>, vector<1x64xf32>
      %85 = vector.broadcast %84 : vector<1x64xf32> to vector<8x64xf32>
      %86 = arith.addf %83, %85 : vector<8x64xf32>
      %cst_65 = arith.constant 0.000000e+00 : f32
      %87 = vector.broadcast %cst_65 : f32 to vector<8x64xf32>
      %88 = arith.maximumf %86, %87 : vector<8x64xf32>
      %89 = arith.truncf %88 : vector<8x64xf32> to vector<8x64xbf16>
      %c0_66 = arith.constant 0 : index
      %c0_67 = arith.constant 0 : index
      %90 = vector.load %arg10[%c0_66, %c0_67] : memref<64x32xbf16, #tpu.memory_space<vmem>>, vector<64x32xbf16>
      %cst_68 = arith.constant dense<0.000000e+00> : vector<8x32xf32>
      %91 = tpu.matmul %89, %90, %cst_68 {dimension_numbers = #tpu.dot_dimension_numbers<[1], [0], [0], [1], [0, 0, 1, 1], [], []>} : vector<8x64xbf16>, vector<64x32xbf16>, vector<8x32xf32> -> vector<8x32xf32>
      %c2 = arith.constant 2 : index
      %c0_69 = arith.constant 0 : index
      %92 = vector.load %arg11[%c2, %c0_69] : memref<7x32xf32, #tpu.memory_space<vmem>>, vector<1x32xf32>
      %93 = vector.broadcast %92 : vector<1x32xf32> to vector<8x32xf32>
      %94 = arith.addf %91, %93 : vector<8x32xf32>
      %95 = arith.addf %80, %94 : vector<8x32xf32>
      %c5 = arith.constant 5 : index
      %c0_70 = arith.constant 0 : index
      %96 = vector.load %arg11[%c5, %c0_70] : memref<7x32xf32, #tpu.memory_space<vmem>>, vector<1x32xf32>
      %c6 = arith.constant 6 : index
      %c0_71 = arith.constant 0 : index
      %97 = vector.load %arg11[%c6, %c0_71] : memref<7x32xf32, #tpu.memory_space<vmem>>, vector<1x32xf32>
      %cst_72 = arith.constant dense<0.000000e+00> : vector<8xf32>
      %98 = vector.multi_reduction <add>, %95, %cst_72 [1] : vector<8x32xf32> to vector<8xf32>
      %99 = vector.shape_cast %98 : vector<8xf32> to vector<8x1xf32>
      %cst_73 = arith.constant 3.200000e+01 : f32
      %100 = vector.broadcast %cst_73 : f32 to vector<8x1xf32>
      %101 = arith.divf %99, %100 : vector<8x1xf32>
      %102 = vector.broadcast %101 : vector<8x1xf32> to vector<8x32xf32>
      %103 = arith.subf %95, %102 : vector<8x32xf32>
      %104 = arith.mulf %103, %103 : vector<8x32xf32>
      %cst_74 = arith.constant dense<0.000000e+00> : vector<8xf32>
      %105 = vector.multi_reduction <add>, %104, %cst_74 [1] : vector<8x32xf32> to vector<8xf32>
      %106 = vector.shape_cast %105 : vector<8xf32> to vector<8x1xf32>
      %cst_75 = arith.constant 3.200000e+01 : f32
      %107 = vector.broadcast %cst_75 : f32 to vector<8x1xf32>
      %108 = arith.divf %106, %107 : vector<8x1xf32>
      %109 = vector.broadcast %101 : vector<8x1xf32> to vector<8x32xf32>
      %110 = arith.subf %95, %109 : vector<8x32xf32>
      %cst_76 = arith.constant 9.99999974E-6 : f32
      %111 = vector.broadcast %cst_76 : f32 to vector<8x1xf32>
      %112 = arith.addf %108, %111 : vector<8x1xf32>
      %113 = math.rsqrt %112 : vector<8x1xf32>
      %114 = vector.broadcast %113 : vector<8x1xf32> to vector<8x32xf32>
      %115 = arith.mulf %110, %114 : vector<8x32xf32>
      %116 = vector.broadcast %96 : vector<1x32xf32> to vector<8x32xf32>
      %117 = arith.mulf %115, %116 : vector<8x32xf32>
      %118 = vector.broadcast %97 : vector<1x32xf32> to vector<8x32xf32>
      %119 = arith.addf %117, %118 : vector<8x32xf32>
      %c0_77 = arith.constant 0 : index
      %c0_78 = arith.constant 0 : index
      %c0_79 = arith.constant 0 : index
      %120 = vector.load %arg13[%c0_77, %c0_78, %c0_79] : memref<1x8x32xf32, #tpu.memory_space<vmem>>, vector<1x8x32xf32>
      %121 = vector.shape_cast %120 : vector<1x8x32xf32> to vector<8x32xf32>
      %122 = vector.shape_cast %119 : vector<8x32xf32> to vector<1x8x32xf32>
      tpu.vector_store %arg13[%c0_77, %c0_78, %c0_79], %122 {strides = array<i32>} : memref<1x8x32xf32, #tpu.memory_space<vmem>>, vector<1x8x32xf32>,
    } else {
    }
    return
  }
  func.func @transform_0(%arg0: i32, %arg1: i32, %arg2: i32) -> (i32, i32, i32) {
    %c0_i32 = arith.constant 0 : i32
    %c0_i32_0 = arith.constant 0 : i32
    return %arg0, %arg1, %c0_i32 : i32, i32, i32
  }
  func.func @transform_1(%arg0: i32, %arg1: i32, %arg2: i32) -> (i32, i32, i32, i32) {
    %c0_i32 = arith.constant 0 : i32
    %c0_i32_0 = arith.constant 0 : i32
    %c0_i32_1 = arith.constant 0 : i32
    return %arg0, %c0_i32, %arg2, %c0_i32_0 : i32, i32, i32, i32
  }
  func.func @transform_2(%arg0: i32, %arg1: i32, %arg2: i32) -> (i32, i32, i32, i32) {
    %c0_i32 = arith.constant 0 : i32
    %c0_i32_0 = arith.constant 0 : i32
    %c0_i32_1 = arith.constant 0 : i32
    return %arg0, %c0_i32, %arg2, %c0_i32_0 : i32, i32, i32, i32
  }
  func.func @transform_3(%arg0: i32, %arg1: i32, %arg2: i32) -> (i32, i32, i32) {
    %c0_i32 = arith.constant 0 : i32
    %c0_i32_0 = arith.constant 0 : i32
    return %arg0, %c0_i32, %arg2 : i32, i32, i32
  }
  func.func @transform_4(%arg0: i32, %arg1: i32, %arg2: i32) -> (i32, i32) {
    %c0_i32 = arith.constant 0 : i32
    %c0_i32_0 = arith.constant 0 : i32
    %c0_i32_1 = arith.constant 0 : i32
    return %c0_i32, %c0_i32_0 : i32, i32
  }
  func.func @transform_5(%arg0: i32, %arg1: i32, %arg2: i32) -> (i32, i32, i32) {
    %c0_i32 = arith.constant 0 : i32
    %c0_i32_0 = arith.constant 0 : i32
    %c0_i32_1 = arith.constant 0 : i32
    %c0_i32_2 = arith.constant 0 : i32
    return %c0_i32, %c0_i32_0, %c0_i32_1 : i32, i32, i32
  }
  func.func @transform_6(%arg0: i32, %arg1: i32, %arg2: i32) -> (i32, i32) {
    %c0_i32 = arith.constant 0 : i32
    %c0_i32_0 = arith.constant 0 : i32
    %c0_i32_1 = arith.constant 0 : i32
    return %c0_i32, %c0_i32_0 : i32, i32
  }
  func.func @transform_7(%arg0: i32, %arg1: i32, %arg2: i32) -> (i32, i32) {
    %c0_i32 = arith.constant 0 : i32
    %c0_i32_0 = arith.constant 0 : i32
    %c0_i32_1 = arith.constant 0 : i32
    return %c0_i32, %c0_i32_0 : i32, i32
  }
  func.func @transform_8(%arg0: i32, %arg1: i32, %arg2: i32) -> (i32, i32) {
    %c0_i32 = arith.constant 0 : i32
    %c0_i32_0 = arith.constant 0 : i32
    %c0_i32_1 = arith.constant 0 : i32
    return %c0_i32, %c0_i32_0 : i32, i32
  }
  func.func @transform_9(%arg0: i32, %arg1: i32, %arg2: i32) -> (i32, i32) {
    %c0_i32 = arith.constant 0 : i32
    %c0_i32_0 = arith.constant 0 : i32
    %c0_i32_1 = arith.constant 0 : i32
    return %c0_i32, %c0_i32_0 : i32, i32
  }
  func.func @transform_10(%arg0: i32, %arg1: i32, %arg2: i32) -> (i32, i32, i32) {
    %c0_i32 = arith.constant 0 : i32
    %c0_i32_0 = arith.constant 0 : i32
    return %arg0, %arg1, %c0_i32 : i32, i32, i32
  }
}

</mosaic_0001>

<bundles_post_ra>
// kernel: tpu_custom_call.1
= control target key start
LH: loop header
LB: loop body
LE: loop exit
PB: predicated region body
PF: predicated region fallthrough
CT: control target
= control target key end

     0   :  { %s3084_s0 = inlined_call_operand.vmem [shape: f32[2,8,32], index: 0, kind: input, shape index: {}]   ;;  %s3085_s1 = inlined_call_operand.vmem [shape: bf16[2,4,8,8], index: 1, kind: input, shape index: {}]   ;;  %s3086_s2 = inlined_call_operand.hbm [shape: bf16[2,4,8,8], index: 2, kind: input, shape index: {}]   ;;  %s3087_s3 = inlined_call_operand.vmem [shape: f32[2,1,8], index: 3, kind: input, shape index: {}]   ;;  %s3088_s4 = inlined_call_operand.hbm [shape: bf16[32,32], index: 4, kind: input, shape index: {}]   ;;  %s3089_s5 = inlined_call_operand.hbm [shape: bf16[4,8,32], index: 5, kind: input, shape index: {}]   ;;  %s3090_s6 = inlined_call_operand.hbm [shape: bf16[32,64], index: 6, kind: input, shape index: {}]   ;;  %s3091_s7 = inlined_call_operand.vmem [shape: bf16[64,32], index: 7, kind: input, shape index: {}]   ;;  %s3092_s8 = inlined_call_operand.vmem [shape: f32[7,32], index: 8, kind: input, shape index: {}]   ;;  %s3093_s9 = inlined_call_operand.vmem [shape: f32[1,64], index: 9, kind: input, shape index: {}]   ;;  %s3094_s10 = inlined_call_operand.hbm [shape: f32[2,8,32], index: 10, kind: output, shape index: {}]  }
   0x1   :  { %3103 = sst [smem:[#allocation21_spill]] %s3085_s1 }
   0x2   :  { %3104 = sst [smem:[#allocation22_spill]] %s3087_s3 }
   0x3   :  { %3105 = sst [smem:[#allocation23_spill]] %s3091_s7 }
   0x4   :  { %3106 = sst [smem:[#allocation24_spill]] %s3093_s9 }
   0x5   :  { %3107 = sst [smem:[#allocation25_spill]] %s3094_s10 }
   0x6   :  { %15 = vsyncpa [#allocation7], 0 }
   0x7   :  { %17 = vsyncpa [#allocation7 + $0x1], 0 }
   0x8   :  { %18 = vsyncpa [#allocation10], 0 }
   0x9   :  { %19 = vsyncpa [#allocation13], 0 }
   0xa   :  { %20 = vsyncpa [#allocation8], 0 }
   0xb   :  { %22 = vsyncpa [#allocation8 + $0x1], 0  ;;  %s2534_s13 = smov 0   ;;  %s2536_s14 = smov 0  }
   0xc   :  { %s2538_s15 = smov 0   ;;  %s2540_s16 = smov 0  }
   0xd   :  { %s2542_s17 = smov 0   ;;  %s2544_s18 = smov 0  }
   0xe LB: > { %3108 = sst [smem:[#allocation19_spill]] %s2441_s13  ;;  %s1922_s19 = sadd.s32 4294967295, %s2461_s18   ;;  %s2461_s18 = sphi %s2544_s18, %s28_s18   ;;  %s2457_s17 = sphi %s2542_s17, %s3136_s17   ;;  %s2453_s16 = sphi %s2540_s16, %s3135_s16   ;;  %s2449_s15 = sphi %s2538_s15, %s3134_s15   ;;  %s2445_s14 = sphi %s2536_s14, %s3133_s14   ;;  %s2441_s13 = sphi %s2534_s13, %s3132_s13  }
   0xf   : > { %s1923_s20 = sadd.s32 4294967294, %s2461_s18   ;;  %p125_p0 = scmp.ne.s32.totalorder %s2445_s14, %s2441_s13 }
  0x10   : > { %p2568_p1 = scmp.eq.s32.totalorder %s1922_s19, 0  ;;  %p2572_p2 = scmp.eq.s32.totalorder %s1922_s19, 1 }
  0x11   : > { %p311_p3 = scmp.eq.s32.totalorder %s1923_s20, 1  ;;  %p1924_p5 = scmp.ge.s32.totalorder %s2461_s18, 1 }
  0x12   : > { %s3109_s21 = scalar_select %p2568_p1, 1, 0 }
  0x13   : > { %s3110_s22 = scalar_select %p2572_p2, 1, 0 }
  0x14   : > { %p2578_p4 = por %p2568_p1, %p125_p0  ;;  %p2583_p6 = por %p311_p3, %p125_p0 }
  0x15   : > { %p318_p7 = scmp.lt.s32.totalorder %s2461_s18, 3  ;;  %s2463_s26 = smov [#allocation9]  }
  0x16   : > { %s3111_s23 = scalar_select %p2578_p4, 1, 0 }
  0x17   : > { %s3112_s24 = scalar_select %p2583_p6, 1, 0 }
  0x18   : > { %p2588_p8 = pnand %p1924_p5, %p318_p7  ;;  %s330_s27 = sshll.u32 %s2463_s26, 4  ;;  %s2592_s27 = int_to_ptr.vmem [resolvable:$true] %s330_s27 }
  0x19   : > { %3113 = sst [smem:[#allocation20_spill]] %s3112_s24  ;;  %s2464_s29 = smov [#allocation11]  }
  0x1a   : > { %s3114_s25 = scalar_select %p2588_p8, 1, 0 }
  0x1b   : > { %p2131_p9 = pneg %p2588_p8  ;;  %s343_s30 = sshll.u32 %s2464_s29, 4  ;;  %s2603_s30 = int_to_ptr.vmem [resolvable:$true] %s343_s30 }
  0x1c   : > { %s2465_s11 = smov [#allocation12]   ;;  %s2257_s26 = scalar_lea.hbm %s3088_s4, 256 }
  0x1d   : > { %p2599_p11 = pnand %p2131_p9, %p2568_p1  ;;  %s2605_s12 = sshll.u32 %s2465_s11, 4  ;;  %s357_s12 = int_to_ptr.vmem [resolvable:$true] %s2605_s12 }
  0x1e   : > { %p2258_p12 = scmp.ne.s32.totalorder %s3088_s4, %s2257_s26  ;;  %p2264_p5 = scmp.lt.u32.totalorder %s2257_s26, %s3088_s4 }
  0x1f   : > { %p2615_p13 = pneg %p2599_p11 }
  0x21   : > { %p2260_p0 = pnand %p2615_p13, %p2258_p12 }
  0x23   : > { %p2261_p3 = pneg %p2260_p0 }
  0x25   : > { %p2266_p7 = pnand %p2264_p5, %p2261_p3 }
  0x27   : > { %2269 = shalt.err (!%p2266_p7)
}
  0x28   : > { %s2270_s13 = scalar_lea.vmem %s2592_s27, 256  ;;  %p2278_p1 = scmp.lt.s32.totalorder %s2592_s27, %s2592_s27 }
  0x29   : > { %p2271_p9 = scmp.ne.s32.totalorder %s2592_s27, %s2270_s13  ;;  %p2279_p4 = scmp.lt.s32.totalorder %s2270_s13, %s2270_s13 }
  0x2b   : > { %p2273_p10 = pnand %p2271_p9, %p2615_p13  ;;  %p2280_p12 = por %p2279_p4, %p2278_p1 }
  0x2d   : > { %p2274_p6 = pneg %p2273_p10 }
  0x2f   : > { %p2281_p0 = pnand %p2280_p12, %p2274_p6 }
  0x31   : > { %2284 = shalt.err (!%p2281_p0)
}
  0x32   : > { %s2466_s24 = smov 64   ;;  %s2467_s19 = smov 4  }
  0x33   : > { %2134 = dma.hbm_to_vmem [thread:$0]  (!%p2599_p11), %s3088_s4, 256, %s2592_s27, [#allocation10], %s2466_s24, %s2466_s24, %s2467_s19  }
  0x34   : > { %s2285_s13 = scalar_lea.hbm %s3089_s5, 256 }
  0x35   : > { %p2286_p1 = scmp.ne.s32.totalorder %s3089_s5, %s2285_s13  ;;  %p2292_p10 = scmp.lt.u32.totalorder %s2285_s13, %s3089_s5 }
  0x37   : > { %p2288_p4 = pnand %p2286_p1, %p2615_p13 }
  0x39   : > { %p2289_p6 = pneg %p2288_p4 }
  0x3b   : > { %p2294_p3 = pnand %p2292_p10, %p2289_p6 }
  0x3d   : > { %2297 = shalt.err (!%p2294_p3)
}
  0x3e   : > { %s2298_s27 = scalar_lea.vmem %s2603_s30, 256  ;;  %p2306_p12 = scmp.lt.s32.totalorder %s2603_s30, %s2603_s30 }
  0x3f   : > { %p2299_p5 = scmp.ne.s32.totalorder %s2603_s30, %s2298_s27  ;;  %p2307_p0 = scmp.lt.s32.totalorder %s2298_s27, %s2298_s27 }
  0x41   : > { %p2301_p7 = pnand %p2299_p5, %p2615_p13  ;;  %p2308_p1 = por %p2307_p0, %p2306_p12 }
  0x43   : > { %p2302_p9 = pneg %p2301_p7 }
  0x45   : > { %p2309_p4 = pnand %p2308_p1, %p2302_p9 }
  0x47   : > { %2312 = shalt.err (!%p2309_p4)
}
  0x48   : > { %2137 = dma.hbm_to_vmem [thread:$0]  (!%p2599_p11), %s3089_s5, 256, %s2603_s30, [#allocation10], %s2466_s24, %s2466_s24, %s2467_s19  }
  0x49   : > { %s2313_s20 = scalar_lea.hbm %s3090_s6, 256 }
  0x4a   : > { %p2314_p6 = scmp.ne.s32.totalorder %s3090_s6, %s2313_s20  ;;  %p2320_p5 = scmp.lt.u32.totalorder %s2313_s20, %s3090_s6 }
  0x4c   : > { %p2316_p10 = pnand %p2314_p6, %p2615_p13 }
  0x4e   : > { %p2317_p3 = pneg %p2316_p10 }
  0x50   : > { %p2322_p7 = pnand %p2320_p5, %p2317_p3 }
  0x52   : > { %2325 = shalt.err (!%p2322_p7)
}
  0x53   : > { %s2326_s27 = scalar_lea.vmem %s357_s12, 256  ;;  %p2334_p1 = scmp.lt.s32.totalorder %s357_s12, %s357_s12 }
  0x54   : > { %p2327_p9 = scmp.ne.s32.totalorder %s357_s12, %s2326_s27  ;;  %p2335_p4 = scmp.lt.s32.totalorder %s2326_s27, %s2326_s27 }
  0x56   : > { %p2329_p12 = pnand %p2327_p9, %p2615_p13  ;;  %p2336_p8 = por %p2335_p4, %p2334_p1 }
  0x58   : > { %p2330_p0 = pneg %p2329_p12 }
  0x5a   : > { %p2337_p2 = pnand %p2336_p8, %p2330_p0 }
  0x5c   : > { %2340 = shalt.err (!%p2337_p2)
}
  0x5d   : > { %2140 = dma.hbm_to_vmem [thread:$0]  (!%p2599_p11), %s3090_s6, 256, %s357_s12, [#allocation13], %s2466_s24, %s2466_s24, %s2467_s19  }
  0x5e   : > { %s112_s10 = sadd.s32 1, %s2449_s15  ;;  %s47_s28 = sadd.s32 1, %s2457_s17 }
  0x5f   : > { %p119_p2 = scmp.ne.s32.totalorder %s2449_s15, %s2445_s14  ;;  %p49_p8 = scmp.ge.s32.totalorder %s47_s28, 2 }
  0x60   : > { %p120_p13 = scmp.eq.s32.totalorder %s2461_s18, 0  ;;  %p3117_p6 = scmp.ne.s32.totalorder %s3110_s22, 0 }
  0x61   : > { %p2152_p3 = scmp.lt.s32.totalorder %s2461_s18, 2  ;;  %s3138_s28 = smov (%p49_p8, %s47_s28), 0 }
  0x62   : > { %p2694_p10 = por %p3117_p6, %p119_p2  ;;  %p121_p5 = por %p120_p13, %p119_p2 }
  0x63   : > { %s400_s7 = sand.u32 1, %s2449_s15   ;;  %s107_s9 = ssub.s32 %s2457_s17, %s3138_s28 }
  0x64   : > { %p110_p7 = scmp.eq.s32.totalorder %s107_s9, 0  ;;  %s1929_s12 = sshll.u32 %s400_s7, 4 }
  0x65   : > { %s1978_s20 = sshll.u32 %s2457_s17, 8  ;;  %s404_s13 = scalar_lea.vmem [#allocation6], %s1929_s12 }
  0x66   : > { %s2706_s26 = scalar_select %p110_p7, %s2449_s15, %s112_s10  }
  0x67   : > { %s2711_s22 = scalar_lea.hbm %s3086_s2, %s1978_s20  ;;  %s412_s27 = sshll.u32 %s404_s13, 4  ;;  %s2713_s27 = int_to_ptr.vmem [resolvable:$true] %s412_s27 }
  0x68   : > { %p2717_p11 = pnand %p2152_p3, %p121_p5  ;;  %s2721_s1 = scalar_lea.sflag [#allocation7], %s400_s7 }
  0x69   : > { %s2341_s10 = scalar_lea.hbm %s2711_s22, 256  ;;  %s2346_s20 = scalar_lea.hbm %s3086_s2, 512 }
  0x6a   : > { %p2342_p9 = scmp.ne.s32.totalorder %s2711_s22, %s2341_s10  ;;  %p2343_p12 = pneg %p2717_p11 }
  0x6b   : > { %p2347_p4 = scmp.lt.u32.totalorder %s2711_s22, %s3086_s2  ;;  %p2348_p2 = scmp.lt.u32.totalorder %s2346_s20, %s2341_s10 }
  0x6c   : > { %p2344_p0 = pnand %p2343_p12, %p2342_p9  ;;  %p2350_p13 = scmp.lt.u32.totalorder %s2341_s10, %s2711_s22 }
  0x6d   : > { %p2349_p8 = por %p2348_p2, %p2347_p4 }
  0x6e   : > { %p2345_p1 = pneg %p2344_p0 }
  0x6f   : > { %p2351_p6 = por %p2350_p13, %p2349_p8 }
  0x71   : > { %p2352_p3 = pnand %p2351_p6, %p2345_p1 }
  0x73   : > { %2355 = shalt.err (!%p2352_p3)
}
  0x74   : > { %s2356_s7 = scalar_lea.vmem %s2713_s27, 256  ;;  %s2468_s13 = smov [#allocation6]  }
  0x75   : > { %p2357_p5 = scmp.ne.s32.totalorder %s2713_s27, %s2356_s7  ;;  %s2361_s9 = sshll.u32 %s2468_s13, 4  ;;  %s2362_s9 = int_to_ptr.vmem [resolvable:$false] %s2361_s9 }
  0x76   : > { %s2363_s12 = scalar_lea.vmem %s2362_s9, 512  ;;  %p2364_p0 = scmp.lt.s32.totalorder %s2713_s27, %s2362_s9 }
  0x77   : > { %p2359_p7 = pnand %p2357_p5, %p2343_p12  ;;  %p2365_p4 = scmp.lt.s32.totalorder %s2363_s12, %s2356_s7 }
  0x79   : > { %p2360_p9 = pneg %p2359_p7  ;;  %p2366_p2 = por %p2365_p4, %p2364_p0 }
  0x7b   : > { %p2367_p8 = pnand %p2366_p2, %p2360_p9 }
  0x7d   : > { %2370 = shalt.err (!%p2367_p8)
}
  0x7e   : > { %2144 = dma.hbm_to_vmem [thread:$0]  (!%p2717_p11), %s2711_s22, 256, %s2713_s27, %s2721_s1, %s2466_s24, %s2466_s24, %s2467_s19  }
  0x7f   : > { %p3120_p12 = scmp.ne.s32.totalorder %s3114_s25, 0 }
  0x80   : > { %s2755_s10 = sand.u32 (!%p3120_p12), 1, %s2445_s14   ;;  %p3121_p1 = scmp.ne.s32.totalorder (!%p3120_p12), %s3111_s23, 0 }
  0x81   : > { %433 = sbr.rel (%p3120_p12) target bundleno = 2620 (0xa3c), region = 60  ;;  %s1933_s20 = sshll.u32 (!%p3120_p12), %s2755_s10, 4 }
  0x82   : > { %s436_s29 = scalar_lea.sflag (!%p3120_p12), [#allocation7], %s2755_s10  ;;  %s2759_s11 = scalar_lea.vmem (!%p3120_p12), [#allocation6], %s1933_s20 }
  0x88   : > { %2424 = dma.done.wait (%p3121_p1), %s436_s29, 256  }
  0x89   : > { %2426 = vsyncadd (%p3121_p1), %s436_s29, 4294967040  ;;  %p3122_p11 = scmp.ne.s32.totalorder %s3109_s21, 0 }
  0x8b   : > { %2428 = dma.done.wait (%p3122_p11), [#allocation10], 512  }
  0x8c   : > { %2430 = vsyncadd (%p3122_p11), [#allocation10], 4294966784 }
  0x8d   : > { %2432 = dma.done.wait (%p3122_p11), [#allocation13], 256  }
  0x8e   : > { %2434 = vsyncadd (%p3122_p11), [#allocation13], 4294967040  ;;  %p509_p13 = scmp.lt.s32.totalorder %s2453_s16, 1  ;;  %v2469_v0 = vmov 0.0   ;;  %vm2470_vm0 = vmmov 0   ;;  %v2221_v1 = vld [vmem:[#allocation9] sm:$0xff]   ;;  %v632_v18 = vlaneseq }
  0x8f   : > { %2015 = vmatprep.subr.bf16.mxu1 %v2469_v0  ;;  %2019 = vmatprep.mubr.msk.bf16.mxu1 %vm2470_vm0, %v2469_v0  ;;  %v2222_v2 = vld [vmem:[#allocation9 + $0x8] sm:$0xff]   ;;  %vm572_vm1 = vcmask 261120   ;;  %v1941_v5 = vld [vmem:[%s3092_s8] ss:$0 sm:$0xff]  ;;  %s2471_s30 = smov 104   ;;  %s2472_s1 = smov 120  }
  0x90   : > { %s2778_s23 = scalar_select %p509_p13, %s2453_s16, 1  ;;  %2029 = vmatprep.subr.bf16.mxu0 %v2469_v0  ;;  %2031 = vmatprep.mubr.msk.bf16.mxu0 %vm2470_vm0, %v2469_v0  ;;  %vm544_vm2 = vcmask 64512   ;;  %v2474_v16 = vmov 1983009808   ;;  %v2475_v19 = vmov 1934713408  }
  0x91   : > { %2016 = vmatpush3.bf16.msra.mxu1 %v2221_v1  ;;  %s2473_s7 = smov 112   ;;  %s3123_s20 = sld [smem:[#allocation21_spill]]  ;;  %545 = vst.msk [vmem:[#allocation5] sm:$0xff] %vm544_vm2, %v2469_v0  ;;  %546 = vst.msk [vmem:[#allocation5 + $0x8] sm:$0xff] %vm544_vm2, %v2469_v0  ;;  %v630_v17 = vunpack.c.l.s4 %v2474_v16  ;;  %v662_v20 = vunpack.c.l.s4 %v2475_v19  ;;  %v2819_v22 = vshrl.u32 %v632_v18, 7  ;;  %vm767_vm3 = vcmask 60416  }
  0x92   : > { %s1938_s21 = sshll.u32 %s2778_s23, 3  ;;  %2017 = vmatprep.subr.bf16.mxu1 %v2469_v0  ;;  %s1979_s13 = sshll.u32 %s2778_s23, 4  ;;  %547 = vst.msk [vmem:[#allocation5 + $0x10] sm:$0xff] %vm544_vm2, %v2469_v0  ;;  %548 = vst.msk [vmem:[#allocation5 + $0x18] sm:$0xff] %vm544_vm2, %v2469_v0  ;;  %vm535_vm4 = vcmask 7168   ;;  %vm1105_vm5 = vcmask 1043456  }
  0x93   : > { %s515_s19 = scalar_lea.vmem %s3084_s0, %s1938_s21  ;;  %v631_v21 = vunpack.c.0.s8 %v630_v17  ;;  %v663_v25 = vunpack.c.0.s8 %v662_v20  ;;  %540 = vst.msk [vmem:[#allocation4] sm:$0xff] %vm535_vm4, %v2469_v0  ;;  %541 = vst.msk [vmem:[#allocation4 + $0x8] sm:$0xff] %vm535_vm4, %v2469_v0  ;;  %s3124_s24 = sld [smem:[#allocation22_spill]]  ;;  %v789_v18 = vsub.s32 0, %v2819_v22  ;;  %vm1678_vm6 = vcmask 523264  }
  0x94   : > { %v2787_v3 = vld [vmem:[%s515_s19] sm:$0xff]  ;;  %542 = vst.msk [vmem:[#allocation4 + $0x10] sm:$0xff] %vm535_vm4, %v2469_v0  ;;  %543 = vst.msk [vmem:[#allocation4 + $0x18] sm:$0xff] %vm535_vm4, %v2469_v0 }
  0x95   : > { %v550_v4 = vpack.c.bf16 %v2787_v3, %v2787_v3  ;;  %2018 = vmatpush3.bf16.msra.mxu1 %v2222_v2  ;;  %v634_v26 = vsub.s32 %v631_v21, %v2819_v22  ;;  %v666_v32 = vsub.s32 %v663_v25, %v2819_v22 }
  0x96   : > { %2023 = vmatprep.subr.bf16.mxu1 %v2469_v0 }
  0x97   : > { %s2803_s29 = scalar_lea.vmem %s3123_s20, %s1979_s13  ;;  %s1975_s20 = sshll.u32 %s2453_s16, 7 }
  0x98   : > { %2020 = vmatmul.mubr.msk.bf16.vlgmr.msra.gmra.mrb[0].mxu1 %vm572_vm1, %v550_v4  ;;  %v772_v12 = vld [vmem:[%s2803_s29] sm:$0xf]  ;;  %v773_v13 = vld [vmem:[%s2803_s29 + $0x4] sm:$0xf]  ;;  %s2478_s16 = smov [#allocation14]  }
  0x99   : > { %2025 = vmatprep.mubr.msk.bf16.mxu1 %vm2470_vm0, %v2469_v0  ;;  %v797_v14 = vsel %vm544_vm2, %v772_v12, 0  ;;  %v843_v15 = vsel %vm544_vm2, %v773_v13, 0  ;;  %s529_s19 = scalar_lea.vmem %s3124_s24, %s2778_s23  ;;  %s3126_s23 = sld [smem:[#allocation24_spill]] }
  0x9a   : > { %2030 = vmatpush3.bf16.xpose.msra.mxu0 %v843_v15  ;;  %v2476_v15 = vmov -inf   ;;  %v780_v16 = vld [vmem:[%s529_s19] sm:$0x1]  ;;  %s3127_s19 = sld [smem:[#allocation25_spill]]  ;;  %s2375_s27 = sshll.u32 %s2478_s16, 4  ;;  %s2376_s27 = int_to_ptr.vmem [resolvable:$false] %s2375_s27 }
  0x9b   : > { %2041 = vmatprep.subr.bf16.mxu0 %v2469_v0  ;;  %537 = vst.msk [vmem:[#allocation3 + $0x8] sm:$0xff] %vm535_vm4, %v2476_v15  ;;  %536 = vst.msk [vmem:[#allocation3] sm:$0xff] %vm535_vm4, %v2476_v15  ;;  %v781_v17 = vmul.f32 -1e+09, %v780_v16 }
  0x9c   : > { %538 = vst.msk [vmem:[#allocation3 + $0x10] sm:$0xff] %vm535_vm4, %v2476_v15  ;;  %539 = vst.msk [vmem:[#allocation3 + $0x18] sm:$0xff] %vm535_vm4, %v2476_v15  ;;  %v778_v15 = vld [vmem:[%s2759_s11 + $0x8] sm:$0xf] }
  0x9d   : > { %v790_v19 = vrot.slane %v781_v17, %v789_v18 }
  0x9e   : > { %2024 = vmatpush3.bf16.xpose.msra.mxu1 %v797_v14 }
  0x9f   : > { %2035 = vmatprep.subr.bf16.mxu1 %v2469_v0 }
 0x16b   : > { %v610_v6 = vpop.f32.mrb[0].mxu1 }
 0x16c   : > { %v611_v7 = vadd.f32 %v1941_v5, %v610_v6  ;;  %v2021_v8 = vpop.f32.mrb[1].mxu1 }
 0x16d   : > { %v613_v9 = vpop.f32.mrb[2].mxu1  ;;  %v775_v8 = vld [vmem:[%s2803_s29 + $0xc] sm:$0xf] }
 0x16e   : > { %v616_v10 = vmul.f32 0.35355338, %v611_v7  ;;  %v2022_v11 = vpop.f32.mrb[3].mxu1  ;;  %v774_v7 = vld [vmem:[%s2803_s29 + $0x8] sm:$0xf] }
 0x16f   : > { %v889_v9 = vsel %vm544_vm2, %v774_v7, 0 }
 0x170   : > { %624 = vrot.lane.b32.xlu1 %v616_v10, %s2471_s30  ;;  %618 = vrot.lane.b32.xlu0 %v616_v10, %s2472_s1  ;;  %s3125_s30 = sld [smem:[#allocation23_spill]]  ;;  %s1937_s1 = sshll.u32 %s2755_s10, 3 }
 0x171   : > { %s508_s29 = scalar_lea.vmem [#allocation14], %s1937_s1  ;;  %s2377_s1 = scalar_lea.vmem %s2376_s27, 256 }
 0x172   : > { %s1764_s21 = sshll.u32 %s508_s29, 4  ;;  %s3036_s21 = int_to_ptr.vmem [resolvable:$true] %s1764_s21 }
 0x173   : > { %s2371_s22 = scalar_lea.vmem %s3036_s21, 128  ;;  %p2378_p7 = scmp.lt.s32.totalorder %s3036_s21, %s2376_s27 }
 0x174   : > { %621 = vrot.lane.b32.xlu0 %v616_v10, %s2473_s7  ;;  %p2372_p6 = scmp.ne.s32.totalorder %s3036_s21, %s2371_s22  ;;  %p2379_p9 = scmp.lt.s32.totalorder %s2377_s1, %s2371_s22 }
 0x176   : > { %p2373_p3 = pnand %p2372_p6, %p2694_p10  ;;  %p2380_p0 = por %p2379_p9, %p2378_p7 }
 0x178   : > { %p2374_p5 = pneg %p2373_p3 }
 0x17a   : > { %p2381_p4 = pnand %p2380_p0, %p2374_p5 }
 0x1e2   : > { %v625_v23 = vpop.permute.xlu1 %624  ;;  %v619_v24 = vpop.permute.xlu0 %618 }
 0x1e3   : > { %v643_v27 = vcombine.low %v619_v24, %v625_v23  ;;  %v644_v28 = vcombine.high %v619_v24, %v625_v23 }
 0x1e5   : > { %v651_v33 = vrot.slane %v643_v27, %v634_v26  ;;  %v658_v34 = vrot.slane %v644_v28, %v634_v26 }
 0x1e6   : > { %v622_v29 = vpop.permute.xlu0 %621 }
 0x1e7   : > { %v627_v30 = vcombine.low %v616_v10, %v622_v29  ;;  %v628_v31 = vcombine.high %v616_v10, %v622_v29  ;;  %v935_v10 = vsel %vm544_vm2, %v775_v8, 0 }
 0x1e9   : > { %v635_v35 = vrot.slane %v627_v30, %v634_v26  ;;  %v642_v36 = vrot.slane %v628_v31, %v634_v26 }
 0x1eb   : > { %v659_v37 = vcombine.low %v635_v35, %v651_v33  ;;  %v660_v38 = vcombine.high %v635_v35, %v651_v33  ;;  %v675_v39 = vcombine.low %v642_v36, %v658_v34  ;;  %v676_v40 = vcombine.high %v642_v36, %v658_v34 }
 0x1ed   : > { %v667_v41 = vrot.slane %v659_v37, %v666_v32  ;;  %v674_v42 = vrot.slane %v660_v38, %v666_v32  ;;  %v683_v43 = vrot.slane %v675_v39, %v666_v32  ;;  %v690_v44 = vrot.slane %v676_v40, %v666_v32 }
 0x1ef   : > { %v695_v45 = vcombine.low %v667_v41, %v674_v42  ;;  %v1945_v46 = vcombine.high %v667_v41, %v674_v42  ;;  %v711_v47 = vcombine.low %v683_v43, %v690_v44  ;;  %v1946_v48 = vcombine.high %v683_v43, %v690_v44 }
 0x1f0   : > { %v2477_v44 = vmov 0  }
 0x1f1   : > { %v702_v49 = vrot.slane %v695_v45, %v634_v26  ;;  %v710_v50 = vrot.slane %v1945_v46, %v634_v26  ;;  %v718_v51 = vrot.slane %v711_v47, %v634_v26  ;;  %v726_v52 = vrot.slane %v1946_v48, %v634_v26  ;;  %2220 = vset.pattern.permute.xlu1 %v2477_v44  ;;  %v2871_v45 = vld [vmem:[#allocation3 + $0x8] sm:$0xff]  ;;  %v2873_v46 = vld [vmem:[#allocation3] sm:$0xff] }
 0x1f2   : > { %2219 = vset.pattern.permute.xlu0 %v2477_v44 }
 0x1f3   : > { %v727_v53 = vcombine.low %v702_v49, %v710_v50  ;;  %v728_v54 = vcombine.high %v702_v49, %v710_v50  ;;  %v743_v55 = vcombine.low %v718_v51, %v726_v52  ;;  %v744_v56 = vcombine.high %v718_v51, %v726_v52 }
 0x1f5   : > { %v735_v57 = vrot.slane %v727_v53, %v666_v32  ;;  %v742_v58 = vrot.slane %v728_v54, %v666_v32  ;;  %v751_v59 = vrot.slane %v743_v55, %v666_v32  ;;  %v758_v60 = vrot.slane %v744_v56, %v666_v32  ;;  %v2891_v53 = vld [vmem:[#allocation3 + $0x18] sm:$0xff]  ;;  %v2893_v54 = vld [vmem:[#allocation3 + $0x10] sm:$0xff] }
 0x1f7   : > { %v759_v61 = vcombine.low %v735_v57, %v751_v59  ;;  %v760_v62 = vcombine.high %v735_v57, %v751_v59  ;;  %v761_v63 = vcombine.low %v742_v58, %v758_v60  ;;  %v762_v1 = vcombine.high %v742_v58, %v758_v60 }
 0x1f9   : > { %v763_v2 = vpack.c.bf16 %v759_v61, %v759_v61  ;;  %v764_v4 = vpack.c.bf16 %v760_v62, %v760_v62  ;;  %v765_v5 = vpack.c.bf16 %v761_v63, %v761_v63  ;;  %v766_v6 = vpack.c.bf16 %v762_v1, %v762_v1  ;;  %v776_v61 = vld [vmem:[%s2759_s11] sm:$0xf]  ;;  %v777_v62 = vld [vmem:[%s2759_s11 + $0x4] sm:$0xf] }
 0x1fa   : > { %v1107_v63 = vsel %vm1105_vm5, %v776_v61, 0  ;;  %v1153_v1 = vsel %vm1105_vm5, %v777_v62, 0 }
 0x1fb   : > { %768 = vst.msk [vmem:[#allocation2] sm:$0xf] %vm767_vm3, %v763_v2  ;;  %769 = vst.msk [vmem:[#allocation2 + $0x4] sm:$0xf] %vm767_vm3, %v764_v4 }
 0x1fc   : > { %770 = vst.msk [vmem:[#allocation2 + $0x8] sm:$0xf] %vm767_vm3, %v765_v5  ;;  %771 = vst.msk [vmem:[#allocation2 + $0xc] sm:$0xf] %vm767_vm3, %v766_v6 }
 0x202   : > { %v782_v11 = vld [vmem:[#allocation2] sm:$0xf]  ;;  %v783_v12 = vld [vmem:[#allocation2 + $0x4] sm:$0xf] }
 0x203   : > { %2026 = vmatmul.mubr.msk.bf16.vlgmr.msra.gmra.mrb[4].mxu1 %vm544_vm2, %v782_v11  ;;  %2032 = vmatmul.mubr.msk.bf16.vlgmr.msra.gmra.mrb[0].mxu0 %vm544_vm2, %v783_v12  ;;  %v784_v13 = vld [vmem:[#allocation2 + $0x8] sm:$0xf]  ;;  %v785_v14 = vld [vmem:[#allocation2 + $0xc] sm:$0xf] }
 0x204   : > { %2036 = vmatpush3.bf16.xpose.msra.mxu1 %v889_v9  ;;  %2042 = vmatpush3.bf16.xpose.msra.mxu0 %v935_v10 }
 0x205   : > { %2037 = vmatprep.mubr.msk.bf16.mxu1 %vm2470_vm0, %v2469_v0  ;;  %2043 = vmatprep.mubr.msk.bf16.mxu0 %vm2470_vm0, %v2469_v0 }
 0x206   : > { %2047 = vmatprep.subr.bf16.mxu1 %v2469_v0  ;;  %2053 = vmatprep.subr.bf16.mxu0 %v2469_v0 }
 0x20b   : > { %2038 = vmatmul.mubr.msk.bf16.vlgmr.msra.gmra.mrb[8].mxu1 %vm544_vm2, %v784_v13  ;;  %2044 = vmatmul.mubr.msk.bf16.vlgmr.msra.gmra.mrb[4].mxu0 %vm544_vm2, %v785_v14  ;;  %v779_v14 = vld [vmem:[%s2759_s11 + $0xc] sm:$0xf]  ;;  %s3034_s11 = scalar_lea.hbm %s3127_s19, %s1975_s20 }
 0x20c   : > { %2049 = vmatprep.mubr.msk.bf16.mxu1 %vm2470_vm0, %v2469_v0  ;;  %2055 = vmatprep.mubr.msk.bf16.mxu0 %vm2470_vm0, %v2469_v0 }
 0x20d   : > { %2048 = vmatpush3.bf16.msra.mxu1 %v1107_v63  ;;  %2054 = vmatpush3.bf16.msra.mxu0 %v1153_v1  ;;  %v1343_v63 = vld [vmem:[#allocation11 + $0x4] sm:$0xf] }
 0x20e   : > { %2059 = vmatprep.subr.bf16.mxu1 %v2469_v0  ;;  %2065 = vmatprep.subr.bf16.mxu0 %v2469_v0  ;;  %v1396_v1 = vsel %vm1105_vm5, %v1343_v63, 0 }
 0x2d6   : > { %v833_v20 = vpop.f32.mrb[4].mxu1  ;;  %v879_v21 = vpop.f32.mrb[0].mxu0 }
 0x2d7   : > { %v2858_v23 = vadd.f32 %v833_v20, %v790_v19  ;;  %v2860_v24 = vadd.f32 %v879_v21, %v790_v19  ;;  %v2027_v25 = vpop.f32.mrb[5].mxu1  ;;  %v2033_v26 = vpop.f32.mrb[1].mxu0  ;;  %v1245_v21 = vsel %vm1105_vm5, %v779_v14, 0 }
 0x2d8   : > { %v836_v27 = vpop.f32.mrb[6].mxu1  ;;  %v882_v28 = vpop.f32.mrb[2].mxu0  ;;  %v1199_v25 = vsel %vm1105_vm5, %v778_v15, 0 }
 0x2d9   : > { %v2028_v29 = vpop.f32.mrb[7].mxu1  ;;  %v2034_v30 = vpop.f32.mrb[3].mxu0  ;;  %v984_v31 = vsel %vm544_vm2, %v2860_v24, -inf  ;;  %v981_v32 = vsel %vm544_vm2, %v2858_v23, -inf }
 0x2da   : > { %985 = vmax.xlane.f32.xlu0 %v984_v31  ;;  %982 = vmax.xlane.f32.xlu1 %v981_v32 }
 0x2de   : > { %v925_v22 = vpop.f32.mrb[8].mxu1  ;;  %v971_v33 = vpop.f32.mrb[4].mxu0 }
 0x2df   : > { %v926_v34 = vadd.f32 %v925_v22, %v790_v19  ;;  %v2866_v35 = vadd.f32 %v971_v33, %v790_v19  ;;  %v2039_v36 = vpop.f32.mrb[9].mxu1  ;;  %v2045_v37 = vpop.f32.mrb[5].mxu0 }
 0x2e0   : > { %v928_v38 = vpop.f32.mrb[10].mxu1  ;;  %v974_v39 = vpop.f32.mrb[6].mxu0 }
 0x2e1   : > { %v2040_v40 = vpop.f32.mrb[11].mxu1  ;;  %v2046_v41 = vpop.f32.mrb[7].mxu0  ;;  %v990_v42 = vsel %vm544_vm2, %v2866_v35, -inf  ;;  %v987_v43 = vsel %vm544_vm2, %v926_v34, -inf  ;;  %v1342_v39 = vld [vmem:[#allocation11] sm:$0xf] }
 0x2e2   : > { %991 = vmax.xlane.f32.xlu1 %v990_v42  ;;  %988 = vmax.xlane.f32.xlu0 %v987_v43  ;;  %v1350_v40 = vsel %vm1105_vm5, %v1342_v39, 0  ;;  %v1042_v41 = vld [vmem:[#allocation4 + $0x8] sm:$0xff]  ;;  %v1041_v42 = vld [vmem:[#allocation4] sm:$0xff]  ;;  %v1345_v39 = vld [vmem:[#allocation11 + $0xc] sm:$0xf] }
 0x367   : > { %v986_v47 = vpop.xlane.xlu0 %985  ;;  %v983_v48 = vpop.xlane.xlu1 %982 }
 0x368   : > { %v2876_v49 = vmax.f32 %v2871_v45, %v986_v47  ;;  %v2879_v50 = vmax.f32 %v2873_v46, %v983_v48 }
 0x36a   : > { %v998_v51 = vsub.f32 %v2871_v45, %v2876_v49  ;;  %1296 = vst.msk [vmem:[#allocation3 + $0x8] sm:$0xff] %vm535_vm4, %v2876_v49  ;;  %v997_v52 = vsub.f32 %v2873_v46, %v2879_v50  ;;  %1295 = vst.msk [vmem:[#allocation3] sm:$0xff] %vm535_vm4, %v2879_v50  ;;  %1016 = vperm.xlu1 %2220, %v2876_v49   ;;  %1011 = vperm.xlu0 %2219, %v2879_v50   ;;  %v1043_v49 = vld [vmem:[#allocation4 + $0x10] sm:$0xff] }
 0x36c   : > { %v1003_v27 = vmul.f32 1.442695, %v998_v51  ;;  %v1001_v22 = vmul.f32 1.442695, %v997_v52  ;;  %v1044_v52 = vld [vmem:[#allocation4 + $0x18] sm:$0xff] }
 0x36f   : > { %v992_v55 = vpop.xlane.xlu1 %991  ;;  %v989_v56 = vpop.xlane.xlu0 %988 }
 0x370   : > { %v2896_v57 = vmax.f32 %v2891_v53, %v992_v55  ;;  %v2899_v58 = vmax.f32 %v2893_v54, %v989_v56 }
 0x372   : > { %v1000_v59 = vsub.f32 %v2891_v53, %v2896_v57  ;;  %1298 = vst.msk [vmem:[#allocation3 + $0x18] sm:$0xff] %vm535_vm4, %v2896_v57  ;;  %v999_v60 = vsub.f32 %v2893_v54, %v2899_v58  ;;  %1297 = vst.msk [vmem:[#allocation3 + $0x10] sm:$0xff] %vm535_vm4, %v2899_v58  ;;  %1021 = vperm.xlu1 %2220, %v2899_v58  }
 0x374   : > { %v1005_v33 = vmul.f32 1.442695, %v999_v60 }
 0x376   : > { %1026 = vperm.xlu1 %2220, %v2896_v57  }
 0x3e9   : > { %v1017_v2 = vpop.permute.xlu1 %1016  ;;  %v1012_v4 = vpop.permute.xlu0 %1011 }
 0x3ea   : > { %v1030_v5 = vsub.f32 %v2860_v24, %v1017_v2  ;;  %v1029_v6 = vsub.f32 %v2858_v23, %v1012_v4 }
 0x3ec   : > { %v1035_v7 = vmul.f32 1.442695, %v1030_v5  ;;  %v1033_v8 = vmul.f32 1.442695, %v1029_v6  ;;  %v1071_v6 = vld [vmem:[#allocation5 + $0x8] sm:$0xff] }
 0x3ee   : > { %2229 = vpow2.f32 %v1035_v7 }
 0x3ef   : > { %2231 = vpow2.f32 %v1033_v8  ;;  %v1070_v8 = vld [vmem:[#allocation5] sm:$0xff] }
 0x3f1   : > { %v1022_v9 = vpop.permute.xlu1 %1021 }
 0x3f2   : > { %v1031_v10 = vsub.f32 %v926_v34, %v1022_v9 }
 0x3f4   : > { %v1037_v11 = vmul.f32 1.442695, %v1031_v10 }
 0x3f5   : > { %v1027_v12 = vpop.permute.xlu1 %1026 }
 0x3f6   : > { %2233 = vpow2.f32 %v1037_v11  ;;  %v1032_v13 = vsub.f32 %v2866_v35, %v1027_v12  ;;  %v1007_v35 = vmul.f32 1.442695, %v1000_v59 }
 0x3f8   : > { %v2230_v16 = vpop.eup %2229  ;;  %v1039_v17 = vmul.f32 1.442695, %v1032_v13 }
 0x3f9   : > { %v2232_v18 = vpop.eup %2231  ;;  %v1052_v19 = vsel %vm544_vm2, %v2230_v16, 0.0  ;;  %v1099_v20 = vpack.c.bf16 %v2230_v16, %v2230_v16 }
 0x3fa   : > { %2235 = vpow2.f32 %v1039_v17  ;;  %1053 = vadd.xlane.f32.xlu0 %v1052_v19  ;;  %v1049_v23 = vsel %vm544_vm2, %v2232_v18, 0.0  ;;  %v1098_v24 = vpack.c.bf16 %v2232_v18, %v2232_v18 }
 0x3fb   : > { %1050 = vadd.xlane.f32.xlu1 %v1049_v23  ;;  %2056 = vmatmul.mubr.msk.bf16.vlgmr.msra.gmra.mrb[8].mxu0 %vm544_vm2, %v1099_v20  ;;  %2237 = vpow2.f32 %v1003_v27  ;;  %v1072_v23 = vld [vmem:[#allocation5 + $0x10] sm:$0xff] }
 0x3fc   : > { %2050 = vmatmul.mubr.msk.bf16.vlgmr.msra.gmra.mrb[12].mxu1 %vm544_vm2, %v1098_v24  ;;  %2066 = vmatpush3.bf16.msra.mxu0 %v1245_v21  ;;  %2239 = vpow2.f32 %v1001_v22 }
 0x3fd   : > { %2060 = vmatpush3.bf16.msra.mxu1 %v1199_v25  ;;  %2061 = vmatprep.mubr.msk.bf16.mxu1 %vm2470_vm0, %v2469_v0  ;;  %2241 = vpow2.f32 %v1005_v33  ;;  %v1073_v25 = vld [vmem:[#allocation5 + $0x18] sm:$0xff] }
 0x3fe   : > { %2067 = vmatprep.mubr.msk.bf16.mxu0 %vm2470_vm0, %v2469_v0  ;;  %2071 = vmatprep.subr.bf16.mxu1 %v2469_v0  ;;  %2243 = vpow2.f32 %v1007_v35 }
 0x3ff   : > { %2077 = vmatprep.subr.bf16.mxu0 %v2469_v0 }
 0x400   : > { %v2234_v26 = vpop.eup %2233 }
 0x401   : > { %v1055_v28 = vsel %vm544_vm2, %v2234_v26, 0.0  ;;  %v1100_v29 = vpack.c.bf16 %v2234_v26, %v2234_v26 }
 0x402   : > { %1056 = vadd.xlane.f32.xlu1 %v1055_v28 }
 0x404   : > { %v2236_v30 = vpop.eup %2235  ;;  %2062 = vmatmul.mubr.msk.bf16.vlgmr.msra.gmra.mrb[16].mxu1 %vm544_vm2, %v1100_v29 }
 0x405   : > { %v1058_v31 = vsel %vm544_vm2, %v2236_v30, 0.0  ;;  %v1101_v32 = vpack.c.bf16 %v2236_v30, %v2236_v30  ;;  %2073 = vmatprep.mubr.msk.bf16.mxu1 %vm2470_vm0, %v2469_v0  ;;  %v2238_v34 = vpop.eup %2237  ;;  %2072 = vmatpush3.bf16.msra.mxu1 %v1350_v40 }
 0x406   : > { %1059 = vadd.xlane.f32.xlu1 %v1058_v31  ;;  %v2240_v36 = vpop.eup %2239  ;;  %2083 = vmatprep.subr.bf16.mxu1 %v2469_v0  ;;  %v1046_v43 = vmul.f32 %v2238_v34, %v1042_v41 }
 0x407   : > { %2068 = vmatmul.mubr.msk.bf16.vlgmr.msra.gmra.mrb[12].mxu0 %vm544_vm2, %v1101_v32  ;;  %v2242_v37 = vpop.eup %2241  ;;  %v1045_v44 = vmul.f32 %v2240_v36, %v1041_v42 }
 0x408   : > { %2079 = vmatprep.mubr.msk.bf16.mxu0 %vm2470_vm0, %v2469_v0  ;;  %v2244_v38 = vpop.eup %2243  ;;  %v1047_v50 = vmul.f32 %v2242_v37, %v1043_v49  ;;  %2078 = vmatpush3.bf16.msra.mxu0 %v1396_v1 }
 0x409   : > { %v1048_v55 = vmul.f32 %v2244_v38, %v1044_v52  ;;  %2089 = vmatprep.subr.bf16.mxu0 %v2469_v0 }
 0x410   : > { %1081 = vperm.xlu0 %2219, %v2238_v34  }
 0x417   : > { %1076 = vperm.xlu1 %2220, %v2240_v36  }
 0x41b   : > { %1086 = vperm.xlu1 %2220, %v2242_v37  }
 0x41f   : > { %1091 = vperm.xlu1 %2220, %v2244_v38  }
 0x487   : > { %v1054_v45 = vpop.xlane.xlu0 %1053 }
 0x488   : > { %v1051_v46 = vpop.xlane.xlu1 %1050  ;;  %v1062_v47 = vadd.f32 %v1054_v45, %v1046_v43  ;;  %v1344_v43 = vld [vmem:[#allocation11 + $0x8] sm:$0xf] }
 0x489   : > { %v1061_v48 = vadd.f32 %v1051_v46, %v1045_v44  ;;  %v1488_v46 = vsel %vm1105_vm5, %v1345_v39, 0 }
 0x48a   : > { %1067 = vst.msk [vmem:[#allocation4 + $0x8] sm:$0xff] %vm535_vm4, %v1062_v47 }
 0x48b   : > { %1066 = vst.msk [vmem:[#allocation4] sm:$0xff] %vm535_vm4, %v1061_v48  ;;  %v1442_v48 = vsel %vm1105_vm5, %v1344_v43, 0 }
 0x48f   : > { %v1057_v51 = vpop.xlane.xlu1 %1056  ;;  %v1082_v7 = vpop.permute.xlu0 %1081 }
 0x490   : > { %v1063_v53 = vadd.f32 %v1057_v51, %v1047_v50  ;;  %v1095_v9 = vmul.f32 %v1082_v7, %v1071_v6 }
 0x491   : > { %v1303_v54 = vld [vmem:[#allocation4 + $0x8] sm:$0xff] }
 0x492   : > { %1068 = vst.msk [vmem:[#allocation4 + $0x10] sm:$0xff] %vm535_vm4, %v1063_v53  ;;  %2245 = vrcp.f32 %v1303_v54  ;;  %v1302_v56 = vld [vmem:[#allocation4] sm:$0xff] }
 0x493   : > { %v1060_v57 = vpop.xlane.xlu1 %1059  ;;  %2247 = vrcp.f32 %v1302_v56 }
 0x494   : > { %v1064_v58 = vadd.f32 %v1060_v57, %v1048_v55 }
 0x496   : > { %1069 = vst.msk [vmem:[#allocation4 + $0x18] sm:$0xff] %vm535_vm4, %v1064_v58 }
 0x497   : > { %v1077_v5 = vpop.permute.xlu1 %1076 }
 0x498   : > { %v1094_v10 = vmul.f32 %v1077_v5, %v1070_v8 }
 0x499   : > { %v1304_v59 = vld [vmem:[#allocation4 + $0x10] sm:$0xff] }
 0x49a   : > { %2249 = vrcp.f32 %v1304_v59 }
 0x49b   : > { %v1087_v11 = vpop.permute.xlu1 %1086 }
 0x49c   : > { %v2246_v60 = vpop.eup %2245  ;;  %v1096_v24 = vmul.f32 %v1087_v11, %v1072_v23 }
 0x49d   : > { %v2248_v61 = vpop.eup %2247  ;;  %1321 = vperm.xlu0 %2219, %v2246_v60   ;;  %v1305_v62 = vld [vmem:[#allocation4 + $0x18] sm:$0xff] }
 0x49e   : > { %1316 = vperm.xlu1 %2220, %v2248_v61   ;;  %2251 = vrcp.f32 %v1305_v62 }
 0x49f   : > { %v1092_v26 = vpop.permute.xlu1 %1091 }
 0x4a0   : > { %v1097_v30 = vmul.f32 %v1092_v26, %v1073_v25 }
 0x4a4   : > { %v2250_v2 = vpop.eup %2249 }
 0x4a5   : > { %1326 = vperm.xlu1 %2220, %v2250_v2  }
 0x4a8   : > { %v2252_v4 = vpop.eup %2251 }
 0x4a9   : > { %1331 = vperm.xlu0 %2219, %v2252_v4  }
 0x4ce   : > { %v1189_v12 = vpop.f32.mrb[8].mxu0 }
 0x4cf   : > { %v1143_v13 = vpop.f32.mrb[12].mxu1  ;;  %v1288_v14 = vadd.f32 %v1189_v12, %v1095_v9  ;;  %v2057_v15 = vpop.f32.mrb[9].mxu0 }
 0x4d0   : > { %v1287_v16 = vadd.f32 %v1143_v13, %v1094_v10  ;;  %v2051_v17 = vpop.f32.mrb[13].mxu1  ;;  %v1192_v18 = vpop.f32.mrb[10].mxu0 }
 0x4d1   : > { %1292 = vst.msk [vmem:[#allocation5 + $0x8] sm:$0xff] %vm544_vm2, %v1288_v14  ;;  %v1146_v19 = vpop.f32.mrb[14].mxu1  ;;  %v2058_v20 = vpop.f32.mrb[11].mxu0  ;;  %v1959_v14 = vld [vmem:[%s3092_s8 + $0x1] ss:$0 sm:$0xff] }
 0x4d2   : > { %1291 = vst.msk [vmem:[#allocation5] sm:$0xff] %vm544_vm2, %v1287_v16  ;;  %v2052_v21 = vpop.f32.mrb[15].mxu1 }
 0x4d7   : > { %v1235_v27 = vpop.f32.mrb[16].mxu1 }
 0x4d8   : > { %v1289_v28 = vadd.f32 %v1235_v27, %v1096_v24  ;;  %v2063_v29 = vpop.f32.mrb[17].mxu1  ;;  %v1311_v37 = vld [vmem:[#allocation5 + $0x8] sm:$0xff] }
 0x4d9   : > { %v1238_v31 = vpop.f32.mrb[18].mxu1  ;;  %v1310_v41 = vld [vmem:[#allocation5] sm:$0xff]  ;;  %v2224_v29 = vld [vmem:[#allocation12 + $0x8] sm:$0xff]  }
 0x4da   : > { %1293 = vst.msk [vmem:[#allocation5 + $0x10] sm:$0xff] %vm544_vm2, %v1289_v28  ;;  %v2064_v32 = vpop.f32.mrb[19].mxu1  ;;  %v1281_v22 = vpop.f32.mrb[12].mxu0  ;;  %v2223_v28 = vld [vmem:[#allocation12] sm:$0xff]  }
 0x4db   : > { %v1290_v33 = vadd.f32 %v1281_v22, %v1097_v30  ;;  %v2069_v34 = vpop.f32.mrb[13].mxu0  ;;  %v2226_v30 = vld [vmem:[%s3125_s30 + $0x8] sm:$0xff]  }
 0x4dc   : > { %v1284_v35 = vpop.f32.mrb[14].mxu0  ;;  %v1960_v34 = vld [vmem:[%s3092_s8 + $0x3] ss:$0 sm:$0xff] }
 0x4dd   : > { %1294 = vst.msk [vmem:[#allocation5 + $0x18] sm:$0xff] %vm544_vm2, %v1290_v33  ;;  %v2070_v36 = vpop.f32.mrb[15].mxu0 }
 0x4de   : > { %v1961_v36 = vld [vmem:[%s3092_s8 + $0x4] ss:$0 sm:$0xff] }
 0x4e1   : > { %v1312_v49 = vld [vmem:[#allocation5 + $0x10] sm:$0xff] }
 0x4e4   : > { %v1313_v54 = vld [vmem:[#allocation5 + $0x18] sm:$0xff] }
 0x51c   : > { %v1322_v38 = vpop.permute.xlu0 %1321 }
 0x51d   : > { %v1335_v40 = vmul.f32 %v1322_v38, %v1311_v37  ;;  %v1317_v42 = vpop.permute.xlu1 %1316 }
 0x51e   : > { %v1334_v44 = vmul.f32 %v1317_v42, %v1310_v41  ;;  %v2228_v41 = vld [vmem:[%s3125_s30 + $0x18] sm:$0xff]   ;;  %v1962_v42 = vld [vmem:[%s3126_s23] ss:$0 sm:$0xff]  ;;  %s1750_s23 = scalar_lea.sflag [#allocation8], %s2755_s10 }
 0x51f   : > { %v1339_v45 = vpack.c.bf16 %v1335_v40, %v1335_v40  ;;  %v2227_v40 = vld [vmem:[%s3125_s30 + $0x10] sm:$0xff]  }
 0x520   : > { %v1338_v47 = vpack.c.bf16 %v1334_v44, %v1334_v44 }
 0x521   : > { %2080 = vmatmul.mubr.msk.bf16.vlgmr.msra.gmra.mrb[16].mxu0 %vm544_vm2, %v1339_v45 }
 0x522   : > { %2074 = vmatmul.mubr.msk.bf16.vlgmr.msra.gmra.mrb[20].mxu1 %vm544_vm2, %v1338_v47  ;;  %2090 = vmatpush3.bf16.msra.mxu0 %v1488_v46 }
 0x523   : > { %2084 = vmatpush3.bf16.msra.mxu1 %v1442_v48  ;;  %2085 = vmatprep.mubr.msk.bf16.mxu1 %vm2470_vm0, %v2469_v0 }
 0x524   : > { %v1327_v50 = vpop.permute.xlu1 %1326  ;;  %2091 = vmatprep.mubr.msk.bf16.mxu0 %vm2470_vm0, %v2469_v0  ;;  %2095 = vmatprep.subr.bf16.mxu1 %v2469_v0 }
 0x525   : > { %v1336_v51 = vmul.f32 %v1327_v50, %v1312_v49  ;;  %2103 = vmatprep.subr.bf16.mxu0 %v2469_v0 }
 0x527   : > { %v1340_v52 = vpack.c.bf16 %v1336_v51, %v1336_v51 }
 0x528   : > { %v1332_v53 = vpop.permute.xlu0 %1331 }
 0x529   : > { %v1337_v55 = vmul.f32 %v1332_v53, %v1313_v54 }
 0x52a   : > { %2086 = vmatmul.mubr.msk.bf16.vlgmr.msra.gmra.mrb[24].mxu1 %vm544_vm2, %v1340_v52 }
 0x52b   : > { %v1341_v56 = vpack.c.bf16 %v1337_v55, %v1337_v55  ;;  %2099 = vmatprep.mubr.msk.bf16.mxu1 %vm2470_vm0, %v2469_v0  ;;  %2096 = vmatpush3.bf16.msra.mxu1 %v2223_v28 }
 0x52c   : > { %2097 = vmatprep.subr.bf16.mxu1 %v2469_v0 }
 0x52d   : > { %2092 = vmatmul.mubr.msk.bf16.vlgmr.msra.gmra.mrb[20].mxu0 %vm544_vm2, %v1341_v56 }
 0x52e   : > { %2111 = vmatprep.mubr.msk.bf16.mxu0 %vm2470_vm0, %v2469_v0 }
 0x52f   : > { %2098 = vmatpush3.bf16.msra.mxu1 %v2224_v29 }
 0x5f4   : > { %v1432_v57 = vpop.f32.mrb[16].mxu0 }
 0x5f5   : > { %v1386_v58 = vpop.f32.mrb[20].mxu1  ;;  %v1532_v59 = vsel %vm572_vm1, %v1432_v57, 0.0  ;;  %v2081_v60 = vpop.f32.mrb[17].mxu0 }
 0x5f6   : > { %v1531_v61 = vsel %vm572_vm1, %v1386_v58, 0.0  ;;  %v2075_v62 = vpop.f32.mrb[21].mxu1  ;;  %v1435_v63 = vpop.f32.mrb[18].mxu0 }
 0x5f7   : > { %v1533_v1 = vadd.f32 %v1532_v59, %v1531_v61  ;;  %v1389_v2 = vpop.f32.mrb[22].mxu1  ;;  %v2082_v4 = vpop.f32.mrb[19].mxu0 }
 0x5f8   : > { %v2076_v5 = vpop.f32.mrb[23].mxu1  ;;  %v1972_v4 = vld [vmem:[%s3092_s8 + $0x5] ss:$0 sm:$0xff] }
 0x5fd   : > { %v1478_v6 = vpop.f32.mrb[24].mxu1 }
 0x5fe   : > { %v1534_v7 = vsel %vm572_vm1, %v1478_v6, 0.0  ;;  %v2087_v8 = vpop.f32.mrb[25].mxu1  ;;  %v1973_v6 = vld [vmem:[%s3092_s8 + $0x6] ss:$0 sm:$0xff] }
 0x5ff   : > { %v1535_v9 = vadd.f32 %v1534_v7, %v1533_v1  ;;  %v1481_v10 = vpop.f32.mrb[26].mxu1 }
 0x600   : > { %v2088_v11 = vpop.f32.mrb[27].mxu1  ;;  %v1524_v12 = vpop.f32.mrb[20].mxu0 }
 0x601   : > { %v1536_v13 = vsel %vm572_vm1, %v1524_v12, 0.0  ;;  %v2093_v15 = vpop.f32.mrb[21].mxu0 }
 0x602   : > { %v1537_v16 = vadd.f32 %v1536_v13, %v1535_v9  ;;  %v1527_v17 = vpop.f32.mrb[22].mxu0 }
 0x603   : > { %v2094_v18 = vpop.f32.mrb[23].mxu0 }
 0x604   : > { %v1543_v19 = vadd.f32 %v1959_v14, %v1537_v16 }
 0x606   : > { %v1545_v20 = vadd.f32 %v1543_v19, %v2787_v3  ;;  %v2225_v3 = vld [vmem:[%s3125_s30] sm:$0xff]  }
 0x607   : > { %2104 = vmatpush3.bf16.msra.mxu0 %v2225_v3 }
 0x608   : > { %v1548_v21 = vsel %vm572_vm1, %v1545_v20, 0.0  ;;  %2105 = vmatprep.subr.bf16.mxu0 %v2469_v0 }
 0x609   : > { %1549 = vadd.xlane.f32.xlu1 %v1548_v21 }
 0x60b   : > { %2106 = vmatpush3.bf16.msra.mxu0 %v2226_v30 }
 0x60c   : > { %2107 = vmatprep.subr.bf16.mxu0 %v2469_v0 }
 0x60f   : > { %2108 = vmatpush3.bf16.msra.mxu0 %v2227_v40 }
 0x610   : > { %2109 = vmatprep.subr.bf16.mxu0 %v2469_v0  ;;  %v1966_v0 = vld [vmem:[%s3092_s8 + $0x2] ss:$0 sm:$0xff] }
 0x613   : > { %2110 = vmatpush3.bf16.msra.mxu0 %v2228_v41 }
 0x696   : > { %v1550_v23 = vpop.xlane.xlu1 %1549 }
 0x697   : > { %v1552_v24 = vmul.f32 0.03125, %v1550_v23 }
 0x699   : > { %v1553_v25 = vsub.f32 %v1545_v20, %v1552_v24 }
 0x69b   : > { %v1554_v26 = vmul.f32 %v1553_v25, %v1553_v25 }
 0x69d   : > { %v1555_v27 = vsel %vm572_vm1, %v1554_v26, 0.0 }
 0x69e   : > { %1556 = vadd.xlane.f32.xlu0 %v1555_v27 }
 0x72b   : > { %v1557_v31 = vpop.xlane.xlu0 %1556 }
 0x72c   : > { %v1558_v32 = vmul.f32 0.03125, %v1557_v31 }
 0x72e   : > { %v1559_v22 = vadd.f32 1e-05, %v1558_v32 }
 0x730   : > { %2253 = vrsqrt.f32 %v1559_v22 }
 0x73a   : > { %v2254_v33 = vpop.eup %2253 }
 0x73b   : > { %v1561_v35 = vmul.f32 %v2254_v33, %v1553_v25 }
 0x73d   : > { %v1566_v37 = vmul.f32 %v1960_v34, %v1561_v35 }
 0x73f   : > { %v1571_v38 = vadd.f32 %v1961_v36, %v1566_v37 }
 0x741   : > { %v1572_v39 = vpack.c.bf16 %v1571_v38, %v1571_v38 }
 0x743   : > { %2100 = vmatmul.mubr.msk.bf16.vlgmr.msra.gmra.mrb[28].mxu1 %vm572_vm1, %v1572_v39 }
 0x816   : > { %v1633_v43 = vpop.f32.mrb[28].mxu1 }
 0x817   : > { %v1634_v44 = vadd.f32 %v1962_v42, %v1633_v43  ;;  %v2101_v45 = vpop.f32.mrb[29].mxu1 }
 0x818   : > { %v1636_v46 = vpop.f32.mrb[30].mxu1 }
 0x819   : > { %v1639_v47 = vmax.f32 %v1634_v44, 0.0  ;;  %v2102_v48 = vpop.f32.mrb[31].mxu1 }
 0x81b   : > { %v1640_v49 = vpack.c.bf16 %v1639_v47, %v1639_v47 }
 0x81d   : > { %2112 = vmatmul.mubr.msk.bf16.vlgmr.msra.gmra.mrb[24].mxu0 %vm1678_vm6, %v1640_v49 }
 0x8f0   : > { %v1716_v50 = vpop.f32.mrb[24].mxu0 }
 0x8f1   : > { %v1717_v51 = vadd.f32 %v1966_v0, %v1716_v50  ;;  %v2113_v52 = vpop.f32.mrb[25].mxu0 }
 0x8f2   : > { %v1719_v53 = vpop.f32.mrb[26].mxu0 }
 0x8f3   : > { %v2114_v54 = vpop.f32.mrb[27].mxu0  ;;  %v1722_v55 = vadd.f32 %v1717_v51, %v1571_v38 }
 0x8f5   : > { %v1725_v56 = vsel %vm572_vm1, %v1722_v55, 0.0 }
 0x8f6   : > { %1726 = vadd.xlane.f32.xlu0 %v1725_v56 }
 0x983   : > { %v1727_v57 = vpop.xlane.xlu0 %1726 }
 0x984   : > { %v1728_v58 = vmul.f32 0.03125, %v1727_v57 }
 0x986   : > { %v1729_v59 = vsub.f32 %v1722_v55, %v1728_v58 }
 0x988   : > { %v1730_v60 = vmul.f32 %v1729_v59, %v1729_v59 }
 0x98a   : > { %v1731_v61 = vsel %vm572_vm1, %v1730_v60, 0.0 }
 0x98b   : > { %1732 = vadd.xlane.f32.xlu1 %v1731_v61 }
 0xa18   : > { %v1733_v62 = vpop.xlane.xlu1 %1732 }
 0xa19   : > { %v1734_v63 = vmul.f32 0.03125, %v1733_v62 }
 0xa1b   : > { %v1735_v1 = vadd.f32 1e-05, %v1734_v63 }
 0xa1d   : > { %2255 = vrsqrt.f32 %v1735_v1 }
 0xa27   : > { %v2256_v2 = vpop.eup %2255 }
 0xa28   : > { %v1737_v5 = vmul.f32 %v2256_v2, %v1729_v59 }
 0xa2a   : > { %v1742_v7 = vmul.f32 %v1972_v4, %v1737_v5 }
 0xa2c   : > { %v1747_v8 = vadd.f32 %v1973_v6, %v1742_v7 }
 0xa2e   : > { %1748 = vst.msk [vmem:[%s508_s29] sm:$0xff] %vm572_vm1, %v1747_v8 }
 0xa2f   : > { %2384 = shalt.err (!%p2381_p4)
}
 0xa30   : > { %s2385_s10 = scalar_lea.hbm %s3034_s11, 128  ;;  %s2389_s9 = scalar_lea.hbm %s3127_s19, 256 }
 0xa31   : > { %p2386_p2 = scmp.ne.s32.totalorder %s3034_s11, %s2385_s10  ;;  %p2390_p1 = scmp.lt.u32.totalorder %s3034_s11, %s3127_s19 }
 0xa32   : > { %p2391_p11 = scmp.lt.u32.totalorder %s2389_s9, %s2385_s10  ;;  %p2393_p6 = scmp.lt.u32.totalorder %s2385_s10, %s3034_s11 }
 0xa33   : > { %p2387_p8 = pnand %p2386_p2, %p2694_p10 }
 0xa34   : > { %p2392_p13 = por %p2391_p11, %p2390_p1 }
 0xa35   : > { %p2388_p12 = pneg %p2387_p8 }
 0xa36   : > { %p2394_p3 = por %p2393_p6, %p2392_p13 }
 0xa38   : > { %p2395_p5 = pnand %p2394_p3, %p2388_p12 }
 0xa3a   : > { %2398 = shalt.err (!%p2395_p5)
}
 0xa3b   : > { %2129 = dma.vmem_to_hbm [thread:$0]  (%p2694_p10), %s3036_s21, 128, %s3034_s11, %s1750_s23  }
 0xa3c PF: > { %s3128_s29 = sld [smem:[#allocation19_spill]]  ;;  %s3129_s25 = sld [smem:[#allocation20_spill]] }
 0xa3d   : > { %p3131_p9 = scmp.ge.s32.totalorder %s2461_s18, 2 }
 0xa42   : > { %s1776_s24 = sand.u32 1, %s3128_s29   ;;  %p3130_p7 = scmp.ne.s32.totalorder %s3129_s25, 0 }
 0xa43   : > { %s1777_s22 = scalar_lea.sflag [#allocation8], %s1776_s24 }
 0xa44   : > { %p2146_p0 = pnand %p3131_p9, %p3130_p7 }
 0xa46   : > { %2436 = dma.done.wait (!%p2146_p0), %s1777_s22, 128  }
 0xa47   : > { %2438 = vsyncadd (!%p2146_p0), %s1777_s22, 4294967168  ;;  %s28_s18 = sadd.s32 1, %s2461_s18   ;;  %s3132_s13 = smov %s2445_s14 }
 0xa48   : > { %p25_p4 = scmp.ge.s32.totalorder %s28_s18, 4   ;;  %s3133_s14 = smov %s2449_s15 }
 0xa49   : > { %s3134_s15 = smov %s2706_s26  ;;  %s3135_s16 = smov %s2457_s17 }
 0xa4a   : > { %s3136_s17 = smov %s3138_s28  ;;  %27 = sbr.rel (!%p25_p4) target bundleno = 14 (0xe), region = 134 }
 0xa51   :  { %1782 = vsyncpa [#allocation7], 1 }
 0xa52   :  { %1784 = vsyncpa [#allocation7 + $0x1], 1 }
 0xa53   :  { %1785 = vsyncpa [#allocation10], 1 }
 0xa54   :  { %1786 = vsyncpa [#allocation13], 1 }
 0xa55   :  { %1787 = vsyncpa [#allocation8], 1 }
 0xa56   :  { %1789 = vsyncpa [#allocation8 + $0x1], 1 }

</bundles_post_ra>
